<compile_context>
chip_gen: v7x
topology: tpu7x:2x2x1
jax: 0.10.0
libtpu: 0.0.40
codegen_flags: <defaults>
</compile_context>

<pallas_src>
import jax
import jax.numpy as jnp
import numpy as np
from jax.experimental import pallas as pl
from jax.experimental.pallas import tpu as pltpu


def _quant_linear_kernel(xh_ref, xl_ref, qw_ref, sh_ref, sl_ref, zh_ref, zl_ref,
                         asc_ref, ainv_ref, b_ref, o_ref, acc_ref):
    """One (m, o, k) grid step.

    xh_ref / xl_ref : (TM, TKH)  f32   activations, first / second half of K
    qw_ref          : (TKH, TO)  int8  plane-packed 4-bit weights (transposed)
    sh/sl/zh/zl_ref : (GPT, TO)  f32   per-group scales / zeros (hi / lo plane)
    asc_ref/ainv_ref: (TM, 1)    f32   per-token act scale and its reciprocal
    b_ref           : (1, TO)    f32   bias
    o_ref           : (TM, TO)   f32   output tile
    acc_ref         : (TM, TO)   f32   VMEM accumulator (persists across k)
    """
    k = pl.program_id(2)
    nk = pl.num_programs(2)

    @pl.when(k == 0)
    def _init():
        acc_ref[...] = jnp.zeros_like(acc_ref)

    # --- per-token 8-bit activation codes (scale deferred to the epilogue) ---
    inv = ainv_ref[...]                                            # (TM, 1)
    xh = jnp.clip(jnp.round(xh_ref[...] * inv), -128.0, 127.0).astype(jnp.bfloat16)
    xl = jnp.clip(jnp.round(xl_ref[...] * inv), -128.0, 127.0).astype(jnp.bfloat16)

    # --- unpack the two 4-bit nibble planes and dequantize per group ---
    qw = qw_ref[...].astype(jnp.int32)                             # (TKH, TO)
    hi = ((qw >> 4) & 15).astype(jnp.float32)                      # cols [k*TKH, ...)
    lo = (qw & 15).astype(jnp.float32)                             # cols [K/2 + k*TKH, ...)

    tkh, to = hi.shape
    gpt = sh_ref.shape[0]
    gs = tkh // gpt                                                # groupsize

    def _expand(v):  # (GPT, TO) -> (TKH, TO): sublane broadcast, layout-trivial reshape
        return jnp.broadcast_to(v[:, None, :], (gpt, gs, to)).reshape(tkh, to)

    w_hi = ((hi - _expand(zh_ref[...])) * _expand(sh_ref[...])).astype(jnp.bfloat16)
    w_lo = ((lo - _expand(zl_ref[...])) * _expand(sl_ref[...])).astype(jnp.bfloat16)

    # --- MXU: bf16 x bf16 -> f32 accumulate ---
    acc_ref[...] += (
        jnp.dot(xh, w_hi, preferred_element_type=jnp.float32)
        + jnp.dot(xl, w_lo, preferred_element_type=jnp.float32)
    )

    # --- epilogue: apply the deferred per-token scale + bias, single HBM write ---
    @pl.when(k == nk - 1)
    def _done():
        o_ref[...] = acc_ref[...] * asc_ref[...] + b_ref[...]


def prepare_weights(qweight, wscales, wzeros):
    """One-time OFFLINE transform from the module's storage format to the kernel layout.

    qweight : (O, K//2) int8  python_compress packing: packed col j = (col 2j << 4) | col 2j+1
    wscales : (O, G)   float  per-output, per-group scale (module's (O*G, 1) reshaped)
    wzeros  : (O, G)   float  per-output, per-group zero point

    Returns
      qw_t : (K//2, O) int8   transposed plane packing: row j = (col j << 4) | col (j + K//2)
      ws_t : (G, O)    f32
      wz_t : (G, O)    f32
    """
    O, Kh = qweight.shape
    K = 2 * Kh
    q = qweight.astype(jnp.int32)                       # sign-extend, then mask nibbles
    hi = (q >> 4) & 15
    lo = q & 15
    codes = jnp.stack([hi, lo], axis=-1).reshape(O, K)  # original (O, K) 4-bit codes
    repacked = ((codes[:, :Kh] << 4) | codes[:, Kh:]).astype(jnp.uint8)
    qw_t = jax.lax.bitcast_convert_type(repacked, jnp.int8).T       # (K//2, O)
    ws_t = jnp.asarray(wscales, jnp.float32).T                      # (G, O)
    wz_t = jnp.asarray(wzeros, jnp.float32).T                       # (G, O)
    return qw_t, ws_t, wz_t


def quant_linear(x, qw_t, ws_t, wz_t, bias, *,
                 block_m=256, block_o=256, block_kh=512):
    """Forward pass of QuantLinear: per-token 8-bit act fake-quant, grouped 4-bit
    weight dequant (to bf16), x @ W.T + bias.

    x     : (..., K) float32
    qw_t  : (K//2, O) int8   from prepare_weights()
    ws_t  : (G, O) float32
    wz_t  : (G, O) float32
    bias  : (O,) float32 or None
    """
    *lead, K = x.shape
    Kh, O = qw_t.shape
    assert K == 2 * Kh, "in_features must match packed weight"
    G = ws_t.shape[0]
    assert ws_t.shape == (G, O) and wz_t.shape == (G, O)
    assert K % G == 0
    gs = K // G
    assert Kh % gs == 0, "plane repacking requires groupsize | in_features/2"

    M = int(np.prod(lead)) if lead else 1
    x2 = x.reshape(M, K).astype(jnp.float32)

    tm = min(block_m, M)
    to = min(block_o, O)
    tkh = min(block_kh, Kh)
    # TODO(synk): pad / mask edge tiles for shapes that are not exact multiples.
    assert M % tm == 0 and O % to == 0 and Kh % tkh == 0
    assert tm % 8 == 0 or tm == M
    assert to % 128 == 0 or to == O
    assert tkh % 128 == 0
    assert tkh % gs == 0, "k-tile must cover whole quant groups"
    gpt = tkh // gs                       # groups per k-tile (per nibble plane)
    assert gpt % 8 == 0 or gpt == G, "need groups-per-tile % 8 == 0 for the scale BlockSpec"
    nkb = Kh // tkh                       # number of k grid steps

    # per-token absmax 8-bit scale (the rest of the act quant is fused in-kernel)
    absmax = jnp.max(jnp.abs(x2), axis=-1, keepdims=True)
    a_scale = jnp.maximum(absmax, 1e-5) / 127.0          # (M, 1)
    a_inv = 1.0 / a_scale                                # (M, 1)
    b2 = (bias if bias is not None else jnp.zeros((O,), jnp.float32))
    b2 = b2.astype(jnp.float32).reshape(1, O)

    grid = (M // tm, O // to, nkb)
    bytes_accessed = (x2.size * 4 + qw_t.size + (ws_t.size + wz_t.size) * 4
                      + M * O * 4 + O * 4 + M * 8)

    out = pl.pallas_call(
        _quant_linear_kernel,
        grid=grid,
        in_specs=[
            pl.BlockSpec((tm, tkh), lambda m, o, k: (m, k)),        # x, first K half
            pl.BlockSpec((tm, tkh), lambda m, o, k: (m, k + nkb)),  # x, second K half
            pl.BlockSpec((tkh, to), lambda m, o, k: (k, o)),        # packed weights
            pl.BlockSpec((gpt, to), lambda m, o, k: (k, o)),        # scales, hi-plane groups
            pl.BlockSpec((gpt, to), lambda m, o, k: (k + nkb, o)),  # scales, lo-plane groups
            pl.BlockSpec((gpt, to), lambda m, o, k: (k, o)),        # zeros,  hi-plane groups
            pl.BlockSpec((gpt, to), lambda m, o, k: (k + nkb, o)),  # zeros,  lo-plane groups
            pl.BlockSpec((tm, 1), lambda m, o, k: (m, 0)),          # a_scale
            pl.BlockSpec((tm, 1), lambda m, o, k: (m, 0)),          # 1 / a_scale
            pl.BlockSpec((1, to), lambda m, o, k: (0, o)),          # bias
        ],
        out_specs=pl.BlockSpec((tm, to), lambda m, o, k: (m, o)),
        out_shape=jax.ShapeDtypeStruct((M, O), jnp.float32),
        scratch_shapes=[pltpu.VMEM((tm, to), jnp.float32)],
        compiler_params=pltpu.CompilerParams(
            dimension_semantics=("parallel", "parallel", "arbitrary")),
        cost_estimate=pl.CostEstimate(
            flops=2 * M * O * K, transcendentals=0,
            bytes_accessed=int(bytes_accessed)),
    )(x2, x2, qw_t, ws_t, ws_t, wz_t, wz_t, a_scale, a_inv, b2)

    return out.reshape(*lead, O)


if __name__ == "__main__":
    # qconfig equivalent: act_quant = {'method': 'per_token', 'bits': 8},
    #                     wt_quant  = {'bits': 4, 'groupsize': 16, 'w4w8': False}, bias=True
    key = jax.random.PRNGKey(0)
    B, S = 2, 8            # batch, seq  -> M = 16 tokens
    K, O = 512, 256        # in_features, out_features
    GS = 16                # weight-quant groupsize
    G = K // GS

    kx, kw, ks, kz, kb = jax.random.split(key, 5)
    x = jax.random.normal(kx, (B, S, K), jnp.float32)
    wint = jax.random.randint(kw, (O, K), 0, 16, jnp.int32)             # 4-bit codes
    wscales = jax.random.uniform(ks, (O, G), jnp.float32, 0.01, 0.05)
    wzeros = jax.random.randint(kz, (O, G), 0, 16, jnp.int32).astype(jnp.float32)
    bias = jax.random.normal(kb, (O,), jnp.float32) * 0.1

    # module storage format: python_compress packs consecutive input pairs into one int8
    packed_u8 = ((wint[:, 0::2] << 4) | wint[:, 1::2]).astype(jnp.uint8)
    qweight = jax.lax.bitcast_convert_type(packed_u8, jnp.int8)         # (O, K//2)

    # one-time offline repack into the kernel's transposed, plane-packed layout
    qw_t, ws_t, wz_t = prepare_weights(qweight, wscales, wzeros)

    # small blocks so this test exercises a real (m, o, k) grid with k-accumulation
    out = quant_linear(x, qw_t, ws_t, wz_t, bias,
                       block_m=128, block_o=128, block_kh=128)
    out = jax.block_until_ready(out)
    assert out.shape == (B, S, O)

    # ---- host reference of QuantLinear.forward (bf16 dequantized weights, per-token
    # 8-bit activation fake-quant, x @ W.T + bias), float64 accumulation ----
    xf = np.asarray(x, np.float32).reshape(-1, K)
    absmax = jnp.max(jnp.abs(jnp.asarray(xf)), axis=-1, keepdims=True)
    a_scale = jnp.maximum(absmax, 1e-5) / 127.0           # same eager ops as the wrapper
    a_inv = 1.0 / a_scale
    codes = np.clip(np.rint(xf * np.asarray(a_inv, np.float32)), -128.0, 127.0)

    s_rep = np.repeat(np.asarray(wscales, np.float32), GS, axis=1)
    z_rep = np.repeat(np.asarray(wzeros, np.float32), GS, axis=1)
    w_f32 = (np.asarray(wint, np.float32) - z_rep) * s_rep
    w_bf16 = np.asarray(jnp.asarray(w_f32).astype(jnp.bfloat16), np.float64)

    ref = (codes.astype(np.float64) @ w_bf16.T) * np.asarray(a_scale, np.float64) \
        + np.asarray(bias, np.float64)
    ref = ref.reshape(B, S, O)

    np.testing.assert_allclose(np.asarray(out, np.float64), ref, rtol=2e-3, atol=2e-3)
    print("KERNEL_OK")
</pallas_src>

<mosaic_0001>
module attributes {stable_mosaic.version = 11 : i64} {
  func.func @_quant_linear_kernel(%arg0: i32, %arg1: i32, %arg2: i32, %arg3: memref<16x128xf32, #tpu.memory_space<vmem>>, %arg4: memref<16x128xf32, #tpu.memory_space<vmem>>, %arg5: memref<128x128xi8, #tpu.memory_space<vmem>>, %arg6: memref<8x128xf32, #tpu.memory_space<vmem>>, %arg7: memref<8x128xf32, #tpu.memory_space<vmem>>, %arg8: memref<8x128xf32, #tpu.memory_space<vmem>>, %arg9: memref<8x128xf32, #tpu.memory_space<vmem>>, %arg10: memref<16x1xf32, #tpu.memory_space<vmem>>, %arg11: memref<16x1xf32, #tpu.memory_space<vmem>>, %arg12: memref<1x128xf32, #tpu.memory_space<vmem>>, %arg13: memref<16x128xf32, #tpu.memory_space<vmem>>, %arg14: memref<16x128xf32, #tpu.memory_space<vmem>>) attributes {dimension_semantics = [#tpu.dimension_semantics<parallel>, #tpu.dimension_semantics<parallel>, #tpu.dimension_semantics<arbitrary>], iteration_bounds = array<i64: 1, 2, 2>, scalar_prefetch = 0 : i64, scratch_operands = 1 : i64, tpu.core_type = #tpu.core_type<tc>, window_params = [{transform_indices = @transform_0, window_bounds = array<i64: 16, 128>}, {transform_indices = @transform_1, window_bounds = array<i64: 16, 128>}, {transform_indices = @transform_2, window_bounds = array<i64: 128, 128>}, {transform_indices = @transform_3, window_bounds = array<i64: 8, 128>}, {transform_indices = @transform_4, window_bounds = array<i64: 8, 128>}, {transform_indices = @transform_5, window_bounds = array<i64: 8, 128>}, {transform_indices = @transform_6, window_bounds = array<i64: 8, 128>}, {transform_indices = @transform_7, window_bounds = array<i64: 16, 1>}, {transform_indices = @transform_8, window_bounds = array<i64: 16, 1>}, {transform_indices = @transform_9, window_bounds = array<i64: 1, 128>}, {transform_indices = @transform_10, window_bounds = array<i64: 16, 128>}]} {
    %c0_i32 = arith.constant 0 : i32
    %0 = arith.cmpi eq, %arg2, %c0_i32 : i32
    %1 = arith.extui %0 : i1 to i32
    %c0_i32_0 = arith.constant 0 : i32
    %2 = arith.cmpi ne, %1, %c0_i32_0 : i32
    scf.if %2 {
      %cst_27 = arith.constant 0.000000e+00 : f32
      %67 = vector.broadcast %cst_27 : f32 to vector<16x128xf32>
      %c0_28 = arith.constant 0 : index
      %c0_29 = arith.constant 0 : index
      %68 = vector.load %arg14[%c0_28, %c0_29] : memref<16x128xf32, #tpu.memory_space<vmem>>, vector<16x128xf32>
      tpu.vector_store %arg14[%c0_28, %c0_29], %67 {strides = array<i32>} : memref<16x128xf32, #tpu.memory_space<vmem>>, vector<16x128xf32>,
    } else {
    }
    %c0 = arith.constant 0 : index
    %c0_1 = arith.constant 0 : index
    %3 = vector.load %arg11[%c0, %c0_1] : memref<16x1xf32, #tpu.memory_space<vmem>>, vector<16x1xf32>
    %c0_2 = arith.constant 0 : index
    %c0_3 = arith.constant 0 : index
    %4 = vector.load %arg3[%c0_2, %c0_3] : memref<16x128xf32, #tpu.memory_space<vmem>>, vector<16x128xf32>
    %5 = vector.broadcast %3 : vector<16x1xf32> to vector<16x128xf32>
    %6 = arith.mulf %4, %5 : vector<16x128xf32>
    %7 = math.roundeven %6 : vector<16x128xf32>
    %cst = arith.constant -1.280000e+02 : f32
    %cst_4 = arith.constant 1.270000e+02 : f32
    %8 = vector.broadcast %cst : f32 to vector<16x128xf32>
    %9 = arith.maximumf %8, %7 : vector<16x128xf32>
    %10 = vector.broadcast %cst_4 : f32 to vector<16x128xf32>
    %11 = arith.minimumf %10, %9 : vector<16x128xf32>
    %12 = arith.truncf %11 : vector<16x128xf32> to vector<16x128xbf16>
    %c0_5 = arith.constant 0 : index
    %c0_6 = arith.constant 0 : index
    %13 = vector.load %arg4[%c0_5, %c0_6] : memref<16x128xf32, #tpu.memory_space<vmem>>, vector<16x128xf32>
    %14 = vector.broadcast %3 : vector<16x1xf32> to vector<16x128xf32>
    %15 = arith.mulf %13, %14 : vector<16x128xf32>
    %16 = math.roundeven %15 : vector<16x128xf32>
    %cst_7 = arith.constant -1.280000e+02 : f32
    %cst_8 = arith.constant 1.270000e+02 : f32
    %17 = vector.broadcast %cst_7 : f32 to vector<16x128xf32>
    %18 = arith.maximumf %17, %16 : vector<16x128xf32>
    %19 = vector.broadcast %cst_8 : f32 to vector<16x128xf32>
    %20 = arith.minimumf %19, %18 : vector<16x128xf32>
    %21 = arith.truncf %20 : vector<16x128xf32> to vector<16x128xbf16>
    %c0_9 = arith.constant 0 : index
    %c0_10 = arith.constant 0 : index
    %22 = vector.load %arg5[%c0_9, %c0_10] : memref<128x128xi8, #tpu.memory_space<vmem>>, vector<128x128xi8>
    %23 = arith.extsi %22 : vector<128x128xi8> to vector<128x128xi32>
    %c4_i32 = arith.constant 4 : i32
    %24 = vector.broadcast %c4_i32 : i32 to vector<128x128xi32>
    %25 = arith.shrsi %23, %24 : vector<128x128xi32>
    %c15_i32 = arith.constant 15 : i32
    %26 = vector.broadcast %c15_i32 : i32 to vector<128x128xi32>
    %27 = arith.andi %25, %26 : vector<128x128xi32>
    %28 = arith.sitofp %27 : vector<128x128xi32> to vector<128x128xf32>
    %c15_i32_11 = arith.constant 15 : i32
    %29 = vector.broadcast %c15_i32_11 : i32 to vector<128x128xi32>
    %30 = arith.andi %23, %29 : vector<128x128xi32>
    %31 = arith.sitofp %30 : vector<128x128xi32> to vector<128x128xf32>
    %c0_12 = arith.constant 0 : index
    %c0_13 = arith.constant 0 : index
    %32 = vector.load %arg8[%c0_12, %c0_13] : memref<8x128xf32, #tpu.memory_space<vmem>>, vector<8x128xf32>
    %33 = vector.shape_cast %32 : vector<8x128xf32> to vector<8x1x128xf32>
    %34 = vector.shape_cast %33 : vector<8x1x128xf32> to vector<8x1x128xf32>
    %35 = vector.broadcast %34 : vector<8x1x128xf32> to vector<8x16x128xf32>
    %36 = vector.shape_cast %35 : vector<8x16x128xf32> to vector<128x128xf32>
    %37 = arith.subf %28, %36 : vector<128x128xf32>
    %c0_14 = arith.constant 0 : index
    %c0_15 = arith.constant 0 : index
    %38 = vector.load %arg6[%c0_14, %c0_15] : memref<8x128xf32, #tpu.memory_space<vmem>>, vector<8x128xf32>
    %39 = vector.shape_cast %38 : vector<8x128xf32> to vector<8x1x128xf32>
    %40 = vector.shape_cast %39 : vector<8x1x128xf32> to vector<8x1x128xf32>
    %41 = vector.broadcast %40 : vector<8x1x128xf32> to vector<8x16x128xf32>
    %42 = vector.shape_cast %41 : vector<8x16x128xf32> to vector<128x128xf32>
    %43 = arith.mulf %37, %42 : vector<128x128xf32>
    %44 = arith.truncf %43 : vector<128x128xf32> to vector<128x128xbf16>
    %c0_16 = arith.constant 0 : index
    %c0_17 = arith.constant 0 : index
    %45 = vector.load %arg9[%c0_16, %c0_17] : memref<8x128xf32, #tpu.memory_space<vmem>>, vector<8x128xf32>
    %46 = vector.shape_cast %45 : vector<8x128xf32> to vector<8x1x128xf32>
    %47 = vector.shape_cast %46 : vector<8x1x128xf32> to vector<8x1x128xf32>
    %48 = vector.broadcast %47 : vector<8x1x128xf32> to vector<8x16x128xf32>
    %49 = vector.shape_cast %48 : vector<8x16x128xf32> to vector<128x128xf32>
    %50 = arith.subf %31, %49 : vector<128x128xf32>
    %c0_18 = arith.constant 0 : index
    %c0_19 = arith.constant 0 : index
    %51 = vector.load %arg7[%c0_18, %c0_19] : memref<8x128xf32, #tpu.memory_space<vmem>>, vector<8x128xf32>
    %52 = vector.shape_cast %51 : vector<8x128xf32> to vector<8x1x128xf32>
    %53 = vector.shape_cast %52 : vector<8x1x128xf32> to vector<8x1x128xf32>
    %54 = vector.broadcast %53 : vector<8x1x128xf32> to vector<8x16x128xf32>
    %55 = vector.shape_cast %54 : vector<8x16x128xf32> to vector<128x128xf32>
    %56 = arith.mulf %50, %55 : vector<128x128xf32>
    %57 = arith.truncf %56 : vector<128x128xf32> to vector<128x128xbf16>
    %c0_20 = arith.constant 0 : index
    %c0_21 = arith.constant 0 : index
    %58 = vector.load %arg14[%c0_20, %c0_21] : memref<16x128xf32, #tpu.memory_space<vmem>>, vector<16x128xf32>
    %cst_22 = arith.constant dense<0.000000e+00> : vector<16x128xf32>
    %59 = tpu.matmul %12, %44, %cst_22 {dimension_numbers = #tpu.dot_dimension_numbers<[1], [0], [0], [1], [0, 0, 1, 1], [], []>} : vector<16x128xbf16>, vector<128x128xbf16>, vector<16x128xf32> -> vector<16x128xf32>
    %cst_23 = arith.constant dense<0.000000e+00> : vector<16x128xf32>
    %60 = tpu.matmul %21, %57, %cst_23 {dimension_numbers = #tpu.dot_dimension_numbers<[1], [0], [0], [1], [0, 0, 1, 1], [], []>} : vector<16x128xbf16>, vector<128x128xbf16>, vector<16x128xf32> -> vector<16x128xf32>
    %61 = arith.addf %59, %60 : vector<16x128xf32>
    %62 = arith.addf %58, %61 : vector<16x128xf32>
    %c0_24 = arith.constant 0 : index
    %c0_25 = arith.constant 0 : index
    %63 = vector.load %arg14[%c0_24, %c0_25] : memref<16x128xf32, #tpu.memory_space<vmem>>, vector<16x128xf32>
    tpu.vector_store %arg14[%c0_24, %c0_25], %62 {strides = array<i32>} : memref<16x128xf32, #tpu.memory_space<vmem>>, vector<16x128xf32>,
    %c1_i32 = arith.constant 1 : i32
    %64 = arith.cmpi eq, %arg2, %c1_i32 : i32
    %65 = arith.extui %64 : i1 to i32
    %c0_i32_26 = arith.constant 0 : i32
    %66 = arith.cmpi ne, %65, %c0_i32_26 : i32
    scf.if %66 {
      %c0_27 = arith.constant 0 : index
      %c0_28 = arith.constant 0 : index
      %67 = vector.load %arg14[%c0_27, %c0_28] : memref<16x128xf32, #tpu.memory_space<vmem>>, vector<16x128xf32>
      %c0_29 = arith.constant 0 : index
      %c0_30 = arith.constant 0 : index
      %68 = vector.load %arg10[%c0_29, %c0_30] : memref<16x1xf32, #tpu.memory_space<vmem>>, vector<16x1xf32>
      %69 = vector.broadcast %68 : vector<16x1xf32> to vector<16x128xf32>
      %70 = arith.mulf %67, %69 : vector<16x128xf32>
      %c0_31 = arith.constant 0 : index
      %c0_32 = arith.constant 0 : index
      %71 = vector.load %arg12[%c0_31, %c0_32] : memref<1x128xf32, #tpu.memory_space<vmem>>, vector<1x128xf32>
      %72 = vector.broadcast %71 : vector<1x128xf32> to vector<16x128xf32>
      %73 = arith.addf %70, %72 : vector<16x128xf32>
      %c0_33 = arith.constant 0 : index
      %c0_34 = arith.constant 0 : index
      %74 = vector.load %arg13[%c0_33, %c0_34] : memref<16x128xf32, #tpu.memory_space<vmem>>, vector<16x128xf32>
      tpu.vector_store %arg13[%c0_33, %c0_34], %73 {strides = array<i32>} : memref<16x128xf32, #tpu.memory_space<vmem>>, vector<16x128xf32>,
    } else {
    }
    return
  }
  func.func @transform_0(%arg0: i32, %arg1: i32, %arg2: i32) -> (i32, i32) {
    %c0_i32 = arith.constant 0 : i32
    return %arg0, %arg2 : i32, i32
  }
  func.func @transform_1(%arg0: i32, %arg1: i32, %arg2: i32) -> (i32, i32) {
    %c2_i32 = arith.constant 2 : i32
    %0 = arith.addi %arg2, %c2_i32 : i32
    %c0_i32 = arith.constant 0 : i32
    return %arg0, %0 : i32, i32
  }
  func.func @transform_2(%arg0: i32, %arg1: i32, %arg2: i32) -> (i32, i32) {
    %c0_i32 = arith.constant 0 : i32
    return %arg2, %arg1 : i32, i32
  }
  func.func @transform_3(%arg0: i32, %arg1: i32, %arg2: i32) -> (i32, i32) {
    %c0_i32 = arith.constant 0 : i32
    return %arg2, %arg1 : i32, i32
  }
  func.func @transform_4(%arg0: i32, %arg1: i32, %arg2: i32) -> (i32, i32) {
    %c2_i32 = arith.constant 2 : i32
    %0 = arith.addi %arg2, %c2_i32 : i32
    %c0_i32 = arith.constant 0 : i32
    return %0, %arg1 : i32, i32
  }
  func.func @transform_5(%arg0: i32, %arg1: i32, %arg2: i32) -> (i32, i32) {
    %c0_i32 = arith.constant 0 : i32
    return %arg2, %arg1 : i32, i32
  }
  func.func @transform_6(%arg0: i32, %arg1: i32, %arg2: i32) -> (i32, i32) {
    %c2_i32 = arith.constant 2 : i32
    %0 = arith.addi %arg2, %c2_i32 : i32
    %c0_i32 = arith.constant 0 : i32
    return %0, %arg1 : i32, i32
  }
  func.func @transform_7(%arg0: i32, %arg1: i32, %arg2: i32) -> (i32, i32) {
    %c0_i32 = arith.constant 0 : i32
    %c0_i32_0 = arith.constant 0 : i32
    return %arg0, %c0_i32 : i32, i32
  }
  func.func @transform_8(%arg0: i32, %arg1: i32, %arg2: i32) -> (i32, i32) {
    %c0_i32 = arith.constant 0 : i32
    %c0_i32_0 = arith.constant 0 : i32
    return %arg0, %c0_i32 : i32, i32
  }
  func.func @transform_9(%arg0: i32, %arg1: i32, %arg2: i32) -> (i32, i32) {
    %c0_i32 = arith.constant 0 : i32
    %c0_i32_0 = arith.constant 0 : i32
    return %c0_i32, %arg1 : i32, i32
  }
  func.func @transform_10(%arg0: i32, %arg1: i32, %arg2: i32) -> (i32, i32) {
    %c0_i32 = arith.constant 0 : i32
    return %arg0, %arg1 : i32, i32
  }
}

</mosaic_0001>

<bundles_post_ra>
// kernel: tpu_custom_call.1
= control target key start
LH: loop header
LB: loop body
LE: loop exit
PB: predicated region body
PF: predicated region fallthrough
CT: control target
= control target key end

     0   :  { %s3476_s0 = inlined_call_operand.hbm [shape: f32[16,512], index: 0, kind: input, shape index: {}]   ;;  %s3477_s1 = inlined_call_operand.hbm [shape: f32[16,512], index: 1, kind: input, shape index: {}]   ;;  %s3478_s2 = inlined_call_operand.hbm [shape: s8[256,256], index: 2, kind: input, shape index: {}]   ;;  %s3479_s3 = inlined_call_operand.hbm [shape: f32[32,256], index: 3, kind: input, shape index: {}]   ;;  %s3480_s4 = inlined_call_operand.hbm [shape: f32[32,256], index: 4, kind: input, shape index: {}]   ;;  %s3481_s5 = inlined_call_operand.hbm [shape: f32[32,256], index: 5, kind: input, shape index: {}]   ;;  %s3482_s6 = inlined_call_operand.hbm [shape: f32[32,256], index: 6, kind: input, shape index: {}]   ;;  %s3483_s7 = inlined_call_operand.vmem [shape: f32[16,1], index: 7, kind: input, shape index: {}]   ;;  %s3484_s8 = inlined_call_operand.vmem [shape: f32[16,1], index: 8, kind: input, shape index: {}]   ;;  %s3485_s9 = inlined_call_operand.vmem [shape: f32[1,256], index: 9, kind: input, shape index: {}]   ;;  %s3486_s10 = inlined_call_operand.hbm [shape: f32[16,256], index: 10, kind: output, shape index: {}]  }
   0x1   :  { %3532 = sst [smem:[#allocation48_spill]] %s3476_s0 }
   0x2   :  { %3533 = sst [smem:[#allocation49_spill]] %s3477_s1 }
   0x3   :  { %3534 = sst [smem:[#allocation50_spill]] %s3478_s2 }
   0x4   :  { %3535 = sst [smem:[#allocation51_spill]] %s3479_s3 }
   0x5   :  { %3536 = sst [smem:[#allocation52_spill]] %s3480_s4 }
   0x6   :  { %3537 = sst [smem:[#allocation53_spill]] %s3481_s5 }
   0x7   :  { %3538 = sst [smem:[#allocation54_spill]] %s3482_s6 }
   0x8   :  { %3539 = sst [smem:[#allocation55_spill]] %s3483_s7 }
   0x9   :  { %3540 = sst [smem:[#allocation56_spill]] %s3484_s8 }
   0xa   :  { %3541 = sst [smem:[#allocation57_spill]] %s3485_s9 }
   0xb   :  { %3542 = sst [smem:[#allocation58_spill]] %s3486_s10 }
   0xc   :  { %15 = vsyncpa [#allocation4], 0 }
   0xd   :  { %17 = vsyncpa [#allocation4 + $0x1], 0 }
   0xe   :  { %18 = vsyncpa [#allocation7], 0 }
   0xf   :  { %20 = vsyncpa [#allocation7 + $0x1], 0 }
  0x10   :  { %21 = vsyncpa [#allocation10], 0 }
  0x11   :  { %23 = vsyncpa [#allocation10 + $0x1], 0 }
  0x12   :  { %24 = vsyncpa [#allocation13], 0 }
  0x13   :  { %26 = vsyncpa [#allocation13 + $0x1], 0 }
  0x14   :  { %27 = vsyncpa [#allocation5], 0 }
  0x15   :  { %29 = vsyncpa [#allocation5 + $0x1], 0  ;;  %s2551_s13 = smov 0   ;;  %s2553_s14 = smov 0  }
  0x16   :  { %s2555_s15 = smov 0   ;;  %s2557_s16 = smov 0  }
  0x17   :  { %s2559_s17 = smov 0   ;;  %s2561_s18 = smov 0  }
  0x18   :  { %s2563_s19 = smov 0   ;;  %s2565_s20 = smov 0  }
  0x19   :  { %s2567_s21 = smov 0   ;;  %s2569_s22 = smov 0  }
  0x1a   :  { %s2571_s23 = smov 0   ;;  %s2573_s24 = smov 0  }
  0x1b   :  { %s2575_s25 = smov 0   ;;  %s2577_s26 = smov 0  }
  0x1c   :  { %s2579_s27 = smov 0   ;;  %s2581_s28 = smov 0  }
  0x1d   :  { %s2583_s29 = smov 0   ;;  %s2585_s30 = smov 0  }
  0x1e   :  { %s2587_s11 = smov 0   ;;  %s2589_s12 = smov 0  }
  0x1f LB: > { %3543 = sst [smem:[#allocation24_spill]] %s2397_s13  ;;  %s47_s10 = sadd.s32 1, %s2465_s30  ;;  %s2473_s12 = sphi %s2589_s12, %s35_s12   ;;  %s2469_s11 = sphi %s2587_s11, %s3672_s11   ;;  %s2465_s30 = sphi %s2585_s30, %s3662_s30   ;;  %s2461_s29 = sphi %s2583_s29, %s3671_s29   ;;  %s2457_s28 = sphi %s2581_s28, %s3660_s28   ;;  %s2453_s27 = sphi %s2579_s27, %s3659_s27   ;;  %s2449_s26 = sphi %s2577_s26, %s3658_s26   ;;  %s2445_s25 = sphi %s2575_s25, %s3670_s25   ;;  %s2441_s24 = sphi %s2573_s24, %s3656_s24   ;;  %s2437_s23 = sphi %s2571_s23, %s3669_s23   ;;  %s2433_s22 = sphi %s2569_s22, %s3668_s22   ;;  %s2429_s21 = sphi %s2567_s21, %s3654_s21   ;;  %s2425_s20 = sphi %s2565_s20, %s3667_s20   ;;  %s2421_s19 = sphi %s2563_s19, %s3666_s19   ;;  %s2417_s18 = sphi %s2561_s18, %s3665_s18   ;;  %s2413_s17 = sphi %s2559_s17, %s3652_s17   ;;  %s2409_s16 = sphi %s2557_s16, %s3651_s16   ;;  %s2405_s15 = sphi %s2555_s15, %s3650_s15   ;;  %s2401_s14 = sphi %s2553_s14, %s3649_s14   ;;  %s2397_s13 = sphi %s2551_s13, %s3648_s13  }
  0x20   : > { %3544 = sst [smem:[#allocation25_spill]] %s2401_s14  ;;  %p3501_p0 = scmp.eq.s32.totalorder %s2473_s12, 0 }
  0x21   : > { %3545 = sst [smem:[#allocation26_spill]] %s2405_s15  ;;  %p2653_p1 = scmp.ge.s32.totalorder %s47_s10, 2 }
  0x22   : > { %3546 = sst [smem:[#allocation27_spill]] %s2409_s16  ;;  %s86_s8 = sadd.s32 2, %s2465_s30 }
  0x23   : > { %3547 = sst [smem:[#allocation28_spill]] %s2413_s17  ;;  %p100_p2 = scmp.ne.s32.totalorder %s2441_s24, %s2437_s23 }
  0x24   : > { %3548 = sst [smem:[#allocation29_spill]] %s2417_s18  ;;  %s3674_s10 = smov (%p2653_p1, %s47_s10), 0 }
  0x25   : > { %3549 = sst [smem:[#allocation30_spill]] %s2429_s21  ;;  %p2667_p3 = por %p100_p2, %p3501_p0 }
  0x26   : > { %3550 = sst [smem:[#allocation31_spill]] %s2441_s24  ;;  %p3500_p5 = scmp.lt.s32.totalorder %s2473_s12, 4 }
  0x27   : > { %3551 = sst [smem:[#allocation32_spill]] %s2445_s25  ;;  %s3499_s4 = sshll.u32 %s2465_s30, 7 }
  0x28   : > { %3552 = sst [smem:[#allocation33_spill]] %s2449_s26  ;;  %s2683_s17 = sand.u32 1, %s2473_s12  }
  0x29   : > { %3553 = sst [smem:[#allocation34_spill]] %s2453_s27  ;;  %s423_s18 = sand.u32 1, %s2441_s24  }
  0x2a   : > { %3554 = sst [smem:[#allocation35_spill]] %s2457_s28  ;;  %s93_s28 = sadd.s32 1, %s2441_s24 }
  0x2b   : > { %3555 = sst [smem:[#allocation36_spill]] %s2461_s29  ;;  %s87_s29 = sadd.s32 2, %s3674_s10 }
  0x2c   : > { %3556 = sst [smem:[#allocation37_spill]] %s2465_s30  ;;  %s2674_s6 = ssub.s32 %s86_s8, %s87_s29 }
  0x2d   : > { %3557 = sst [smem:[#allocation38_spill]] %s2469_s11  ;;  %p91_p6 = scmp.eq.s32.totalorder %s2674_s6, 0 }
  0x2e   : > { %3559 = sst [smem:[#allocation39_spill]] %s3674_s10  ;;  %s1722_s2 = sshll.u32 %s423_s18, 4 }
  0x2f   : > { %s2680_s16 = scalar_select %p91_p6, %s2441_s24, %s93_s28  }
  0x30   : > { %s3562_s1 = sld [smem:[#allocation49_spill]]  ;;  %s425_s8 = scalar_lea.vmem [#allocation6], %s1722_s2 }
  0x31   : > { %3561 = sst [smem:[#allocation40_spill]] %s2680_s16  ;;  %s435_s29 = sshll.u32 %s425_s8, 4  ;;  %s2701_s29 = int_to_ptr.vmem [resolvable:$true] %s435_s29 }
  0x32   : > { %p2697_p7 = pnand %p3500_p5, %p2667_p3  ;;  %s3502_s0 = scalar_lea.sflag [#allocation7], %s2683_s17 }
  0x34   : > { %p2044_p11 = pneg %p2697_p7 }
  0x36   : > { %s1493_s26 = scalar_lea.hbm %s3562_s1, %s3499_s4  ;;  %s2047_s25 = scalar_lea.hbm %s3562_s1, 1024 }
  0x37   : > { %s2691_s27 = scalar_lea.hbm %s1493_s26, 256  ;;  %s2072_s18 = scalar_lea.hbm %s1493_s26, 512 }
  0x38   : > { %p2043_p10 = scmp.ne.s32.totalorder %s2691_s27, %s2072_s18  ;;  %p2048_p2 = scmp.lt.u32.totalorder %s2691_s27, %s3562_s1 }
  0x39   : > { %p2049_p3 = scmp.lt.u32.totalorder %s2047_s25, %s2072_s18  ;;  %p2051_p5 = scmp.lt.u32.totalorder %s2072_s18, %s2691_s27 }
  0x3a   : > { %p2045_p12 = pnand %p2044_p11, %p2043_p10 }
  0x3b   : > { %p2050_p6 = por %p2049_p3, %p2048_p2 }
  0x3c   : > { %p2046_p13 = pneg %p2045_p12 }
  0x3d   : > { %p2052_p0 = por %p2051_p5, %p2050_p6 }
  0x3f   : > { %p2053_p4 = pnand %p2052_p0, %p2046_p13 }
  0x41   : > { %2056 = shalt.err (!%p2053_p4)
}
  0x42   : > { %s2057_s26 = scalar_lea.vmem %s2701_s29, 256  ;;  %s2475_s2 = smov [#allocation6]  }
  0x43   : > { %p2058_p10 = scmp.ne.s32.totalorder %s2701_s29, %s2057_s26  ;;  %s2062_s9 = sshll.u32 %s2475_s2, 4  ;;  %s2063_s9 = int_to_ptr.vmem [resolvable:$false] %s2062_s9 }
  0x44   : > { %s2064_s4 = scalar_lea.vmem %s2063_s9, 512  ;;  %p2065_p9 = scmp.lt.s32.totalorder %s2701_s29, %s2063_s9 }
  0x45   : > { %p2060_p12 = pnand %p2058_p10, %p2044_p11  ;;  %p2066_p2 = scmp.lt.s32.totalorder %s2064_s4, %s2057_s26 }
  0x47   : > { %p2061_p8 = pneg %p2060_p12  ;;  %p2067_p3 = por %p2066_p2, %p2065_p9 }
  0x49   : > { %p2068_p5 = pnand %p2067_p3, %p2061_p8 }
  0x4b   : > { %2071 = shalt.err (!%p2068_p5)
}
  0x4c   : > { %s3503_s18 = smov 512   ;;  %s3504_s25 = smov 128  }
  0x4d   : > { %s3506_s8 = smov 8   ;;  %p3564_p0 = scmp.lt.s32.totalorder %s2473_s12, 5 }
  0x4e   : > { %1841 = dma.hbm_to_vmem [thread:$0]  (!%p2697_p7), %s2691_s27, 256, %s2701_s29, %s3502_s0, %s3503_s18, %s3504_s25, %s3506_s8  }
  0x4f   : > { %p3565_p4 = scmp.ge.s32.totalorder %s2473_s12, 1  ;;  %s2744_s2 = sadd.s32 4294967295, %s2473_s12  }
  0x50   : > { %3567 = sst [smem:[#allocation41_spill]] %s2744_s2  ;;  %s1715_s9 = sadd.s32 4294967294, %s2473_s12  }
  0x51   : > { %p2739_p8 = pnand %p3565_p4, %p3564_p0  ;;  %s50_s28 = sadd.s32 1, %s2469_s11 }
  0x52   : > { %s3676_s28 = smov (!%p2653_p1, %s50_s28), %s2469_s11  ;;  %s2753_s4 = ssub.s32 %s2465_s30, %s3674_s10 }
  0x53   : > { %s3566_s26 = scalar_select %p2739_p8, 1, 0 }
  0x54   : > { %p3515_p7 = scmp.eq.s32.totalorder %s2744_s2, 0  ;;  %p52_p9 = scmp.ge.s32.totalorder %s3676_s28, 2 }
  0x55   : > { %p3568_p13 = scmp.ne.s32.totalorder %s2437_s23, %s2433_s22  ;;  %s121_s7 = sadd.s32 1, %s2429_s21 }
  0x56   : > { %s3678_s28 = smov (%p52_p9, %s3676_s28), 0  ;;  %p128_p1 = scmp.ne.s32.totalorder %s2429_s21, %s2425_s20 }
  0x57   : > { %p2762_p6 = por %p3568_p13, %p3515_p7  ;;  %3570 = sst [smem:[#allocation42_spill]] %s3678_s28 }
  0x58   : > { %p134_p10 = scmp.ne.s32.totalorder %s2425_s20, %s2421_s19  ;;  %s2775_s29 = ssub.s32 %s2469_s11, %s3678_s28 }
  0x59   : > { %s3569_s27 = scalar_select %p2762_p6, 1, 0 }
  0x5a   : > { %s343_s0 = sadd.s32 1, %s2405_s15  ;;  %s118_s22 = sor.u32 %s2775_s29, %s2753_s4 }
  0x5b   : > { %p3571_p12 = scmp.eq.s32.totalorder %s2473_s12, 0  ;;  %p119_p3 = scmp.eq.s32.totalorder %s118_s22, 0 }
  0x5c   : > { %p2788_p5 = por %p134_p10, %p3515_p7  ;;  %p341_p0 = scmp.eq.s32.totalorder %s2775_s29, 0 }
  0x5d   : > { %p2782_p2 = por %p128_p1, %p3571_p12  ;;  %p353_p4 = scmp.ne.s32.totalorder %s2405_s15, %s2401_s14 }
  0x5e   : > { %s3573_s25 = scalar_select %p2788_p5, 1, 0 }
  0x5f   : > { %s2796_s19 = scalar_select %p119_p3, %s2429_s21, %s121_s7  }
  0x60   : > { %s2799_s8 = scalar_select %p341_p0, %s2405_s15, %s343_s0  }
  0x61   : > { %3574 = sst [smem:[#allocation43_spill]] %s2796_s19  ;;  %p354_p9 = scmp.eq.s32.totalorder %s2744_s2, 3 }
  0x62   : > { %3575 = sst [smem:[#allocation44_spill]] %s2799_s8  ;;  %p359_p13 = scmp.ne.s32.totalorder %s2401_s14, %s2397_s13 }
  0x63   : > { %p360_p1 = scmp.eq.s32.totalorder %s1715_s9, 3  ;;  %s447_s1 = sand.u32 1, %s2429_s21  }
  0x64   : > { %p2805_p12 = por %p354_p9, %p353_p4  ;;  %s1724_s28 = sshll.u32 %s447_s1, 5 }
  0x65   : > { %p2809_p10 = por %p360_p1, %p359_p13  ;;  %s449_s16 = scalar_lea.vmem [#allocation8], %s1724_s28 }
  0x66   : > { %s3576_s22 = scalar_select %p2805_p12, 1, 0 }
  0x67   : > { %s3578_s10 = scalar_select %p2809_p10, 1, 0 }
  0x68   : > { %3577 = sst [smem:[#allocation45_spill]] %s3576_s22  ;;  %s458_s24 = sshll.u32 %s449_s16, 4  ;;  %s2821_s24 = int_to_ptr.vmem [resolvable:$true] %s458_s24 }
  0x69   : > { %3579 = sst [smem:[#allocation46_spill]] %s3578_s10  ;;  %p3580_p3 = scmp.lt.s32.totalorder %s2473_s12, 4 }
  0x6a   : > { %s2823_s9 = sshll.u32 %s447_s1, 3  ;;  %s1729_s7 = sshll.u32 %s2465_s30, 1 }
  0x6b   : > { %p2817_p0 = pnand %p3580_p3, %p2782_p2  ;;  %s477_s19 = sadd.s32 %s2469_s11, %s1729_s7 }
  0x6c   : > { %s472_s21 = scalar_lea.vmem [#allocation9], %s2823_s9  ;;  %s2828_s15 = sshll.u32 %s477_s19, 7 }
  0x6d   : > { %s3581_s0 = scalar_select %p2817_p0, 1, 0 }
  0x6e   : > { %s481_s8 = sshll.u32 %s472_s21, 4  ;;  %s3582_s3 = sld [smem:[#allocation51_spill]]  ;;  %s2830_s8 = int_to_ptr.vmem [resolvable:$true] %s481_s8 }
  0x6f   : > { %p2843_p4 = pneg %p2817_p0 }
  0x74   : > { %s2836_s28 = scalar_lea.hbm %s3582_s3, %s2828_s15  ;;  %s2078_s16 = scalar_lea.hbm %s3582_s3, 1024 }
  0x75   : > { %s2073_s10 = scalar_lea.hbm %s2836_s28, 128  ;;  %p2079_p1 = scmp.lt.u32.totalorder %s2836_s28, %s3582_s3 }
  0x76   : > { %p2074_p2 = scmp.ne.s32.totalorder %s2836_s28, %s2073_s10  ;;  %p2080_p3 = scmp.lt.u32.totalorder %s2078_s16, %s2073_s10 }
  0x77   : > { %p2082_p11 = scmp.lt.u32.totalorder %s2073_s10, %s2836_s28 }
  0x78   : > { %p2076_p9 = pnand %p2843_p4, %p2074_p2  ;;  %p2081_p7 = por %p2080_p3, %p2079_p1 }
  0x7a   : > { %p2077_p13 = pneg %p2076_p9  ;;  %p2083_p10 = por %p2082_p11, %p2081_p7 }
  0x7c   : > { %p2084_p12 = pnand %p2083_p10, %p2077_p13 }
  0x7e   : > { %2087 = shalt.err (!%p2084_p12)
}
  0x7f   : > { %s2088_s1 = scalar_lea.vmem %s2830_s8, 128  ;;  %s2479_s19 = smov [#allocation9]  }
  0x80   : > { %p2089_p2 = scmp.ne.s32.totalorder %s2830_s8, %s2088_s1  ;;  %s2093_s7 = sshll.u32 %s2479_s19, 4  ;;  %s2094_s7 = int_to_ptr.vmem [resolvable:$false] %s2093_s7 }
  0x81   : > { %s2095_s13 = scalar_lea.vmem %s2094_s7, 256  ;;  %p2096_p6 = scmp.lt.s32.totalorder %s2830_s8, %s2094_s7 }
  0x82   : > { %p2091_p9 = pnand %p2089_p2, %p2843_p4  ;;  %p2097_p8 = scmp.lt.s32.totalorder %s2095_s13, %s2088_s1 }
  0x84   : > { %p2092_p5 = pneg %p2091_p9  ;;  %p2098_p1 = por %p2097_p8, %p2096_p6 }
  0x86   : > { %p2099_p3 = pnand %p2098_p1, %p2092_p5 }
  0x88   : > { %2102 = shalt.err (!%p2099_p3)
}
  0x89   : > { %s3584_s10 = scalar_lea.sflag [#allocation10], %s2683_s17  ;;  %s3585_s5 = sld [smem:[#allocation53_spill]] }
  0x8a   : > { %1847 = dma.hbm_to_vmem [thread:$0]  (!%p2817_p0), %s2836_s28, 128, %s2830_s8, %s3584_s10  }
  0x8b   : > { %s513_s1 = scalar_lea.vmem [#allocation12], %s2823_s9  ;;  %s3525_s13 = scalar_lea.sflag [#allocation13], %s2683_s17 }
  0x8c   : > { %s522_s7 = sshll.u32 %s513_s1, 4  ;;  %s523_s7 = int_to_ptr.vmem [resolvable:$true] %s522_s7 }
  0x8f   : > { %s2872_s19 = scalar_lea.hbm %s3585_s5, %s2828_s15  ;;  %s2108_s28 = scalar_lea.hbm %s3585_s5, 1024 }
  0x90   : > { %s2103_s3 = scalar_lea.hbm %s2872_s19, 128  ;;  %p2109_p6 = scmp.lt.u32.totalorder %s2872_s19, %s3585_s5 }
  0x91   : > { %p2104_p8 = scmp.ne.s32.totalorder %s2872_s19, %s2103_s3  ;;  %p2110_p5 = scmp.lt.u32.totalorder %s2108_s28, %s2103_s3 }
  0x92   : > { %p2112_p10 = scmp.lt.u32.totalorder %s2103_s3, %s2872_s19 }
  0x93   : > { %p2106_p7 = pnand %p2104_p8, %p2843_p4  ;;  %p2111_p12 = por %p2110_p5, %p2109_p6 }
  0x95   : > { %p2107_p11 = pneg %p2106_p7  ;;  %p2113_p13 = por %p2112_p10, %p2111_p12 }
  0x97   : > { %p2114_p2 = pnand %p2113_p13, %p2107_p11 }
  0x99   : > { %2117 = shalt.err (!%p2114_p2)
}
  0x9a   : > { %s2118_s9 = scalar_lea.vmem %s523_s7, 128  ;;  %s2480_s18 = smov [#allocation12]  }
  0x9b   : > { %p2119_p9 = scmp.ne.s32.totalorder %s523_s7, %s2118_s9  ;;  %s2123_s1 = sshll.u32 %s2480_s18, 4  ;;  %s2124_s1 = int_to_ptr.vmem [resolvable:$false] %s2123_s1 }
  0x9c   : > { %s2125_s22 = scalar_lea.vmem %s2124_s1, 256  ;;  %p2126_p8 = scmp.lt.s32.totalorder %s523_s7, %s2124_s1 }
  0x9d   : > { %p2121_p1 = pnand %p2119_p9, %p2843_p4  ;;  %p2127_p7 = scmp.lt.s32.totalorder %s2125_s22, %s2118_s9 }
  0x9f   : > { %p2122_p3 = pneg %p2121_p1  ;;  %p2128_p0 = por %p2127_p7, %p2126_p8 }
  0xa1   : > { %p2129_p5 = pnand %p2128_p0, %p2122_p3 }
  0xa3   : > { %2132 = shalt.err (!%p2129_p5)
}
  0xa4   : > { %p3586_p6 = scmp.ne.s32.totalorder %s3581_s0, 0  ;;  %s3587_s3 = sld [smem:[#allocation34_spill]] }
  0xa5   : > { %s3588_s8 = sld [smem:[#allocation33_spill]]  ;;  %s3589_s28 = sld [smem:[#allocation32_spill]] }
  0xa6   : > { %1853 = dma.hbm_to_vmem [thread:$0]  (!%p3586_p6), %s2872_s19, 128, %s523_s7, %s3525_s13  }
  0xa7   : > { %p3590_p11 = scmp.eq.s32.totalorder %s2753_s4, 0  ;;  %p3592_p12 = scmp.eq.s32.totalorder %s2473_s12, 0 }
  0xa8   : > { %s3593_s18 = sshll.u32 %s2465_s30, 7  ;;  %s3594_s5 = sld [smem:[#allocation48_spill]] }
  0xa9   : > { %p3595_p2 = scmp.eq.s32.totalorder %s2744_s2, 0  ;;  %p3597_p1 = scmp.lt.s32.totalorder %s2473_s12, 4 }
  0xaa   : > { %s63_s10 = sadd.s32 1, %s3587_s3  ;;  %s398_s9 = sand.u32 1, %s3587_s3  }
  0xab   : > { %p70_p0 = scmp.ne.s32.totalorder %s3587_s3, %s3588_s8  ;;  %p76_p13 = scmp.ne.s32.totalorder %s3588_s8, %s3589_s28 }
  0xac   : > { %s2901_s16 = scalar_select %p3590_p11, %s3587_s3, %s63_s10  }
  0xad   : > { %p72_p10 = por %p3592_p12, %p70_p0  ;;  %p2917_p9 = por %p3595_p2, %p76_p13 }
  0xae   : > { %3591 = sst [smem:[#allocation47_spill]] %s2901_s16  ;;  %s2913_s14 = scalar_lea.hbm %s3594_s5, %s3593_s18 }
  0xaf   : > { %s3596_s19 = scalar_select %p2917_p9, 1, 0 }
  0xb0   : > { %s1720_s4 = sshll.u32 %s398_s9, 4  ;;  %p2923_p3 = pnand %p3597_p1, %p72_p10 }
  0xb1   : > { %s1756_s3 = sshll.u32 %s2465_s30, 3  ;;  %s402_s8 = scalar_lea.vmem [#allocation3], %s1720_s4 }
  0xb2   : > { %s411_s28 = sshll.u32 %s402_s8, 4  ;;  %s2931_s10 = sadd.s32 %s2469_s11, %s1756_s3  ;;  %s2928_s28 = int_to_ptr.vmem [resolvable:$true] %s411_s28 }
  0xb3   : > { %s2933_s18 = scalar_lea.sflag [#allocation4], %s398_s9  ;;  %s2133_s1 = scalar_lea.hbm %s2913_s14, 256 }
  0xb4   : > { %p2134_p8 = scmp.ne.s32.totalorder %s2913_s14, %s2133_s1  ;;  %p2135_p7 = pneg %p2923_p3 }
  0xb5   : > { %s2138_s30 = scalar_lea.hbm %s3594_s5, 1024  ;;  %p2139_p11 = scmp.lt.u32.totalorder %s2913_s14, %s3594_s5 }
  0xb6   : > { %p2136_p5 = pnand %p2135_p7, %p2134_p8  ;;  %p2140_p12 = scmp.lt.u32.totalorder %s2138_s30, %s2133_s1 }
  0xb7   : > { %p2142_p13 = scmp.lt.u32.totalorder %s2133_s1, %s2913_s14 }
  0xb8   : > { %p2137_p0 = pneg %p2136_p5  ;;  %p2141_p10 = por %p2140_p12, %p2139_p11 }
  0xba   : > { %p2143_p2 = por %p2142_p13, %p2141_p10 }
  0xbc   : > { %p2144_p1 = pnand %p2143_p2, %p2137_p0 }
  0xbe   : > { %2147 = shalt.err (!%p2144_p1)
}
  0xbf   : > { %s2148_s9 = scalar_lea.vmem %s2928_s28, 256  ;;  %s2481_s13 = smov [#allocation3]  }
  0xc0   : > { %p2149_p8 = scmp.ne.s32.totalorder %s2928_s28, %s2148_s9  ;;  %s2153_s3 = sshll.u32 %s2481_s13, 4  ;;  %s2154_s3 = int_to_ptr.vmem [resolvable:$false] %s2153_s3 }
  0xc1   : > { %s2155_s22 = scalar_lea.vmem %s2154_s3, 512  ;;  %p2156_p6 = scmp.lt.s32.totalorder %s2928_s28, %s2154_s3 }
  0xc2   : > { %p2151_p5 = pnand %p2149_p8, %p2135_p7  ;;  %p2157_p11 = scmp.lt.s32.totalorder %s2155_s22, %s2148_s9 }
  0xc4   : > { %p2152_p9 = pneg %p2151_p5  ;;  %p2158_p12 = por %p2157_p11, %p2156_p6 }
  0xc6   : > { %p2159_p10 = pnand %p2158_p12, %p2152_p9 }
  0xc8   : > { %2162 = shalt.err (!%p2159_p10)
}
  0xc9   : > { %s3599_s30 = smov 8   ;;  %s3600_s1 = smov 128  }
  0xca   : > { %s3601_s4 = smov 512   ;;  %s1727_s8 = sshll.u32 %s2931_s10, 7 }
  0xcb   : > { %1838 = dma.hbm_to_vmem [thread:$0]  (!%p2923_p3), %s2913_s14, 256, %s2928_s28, %s2933_s18, %s3601_s4, %s3600_s1, %s3599_s30  }
  0xcc   : > { %s3602_s11 = sld [smem:[#allocation50_spill]] }
  0xd2   : > { %s3603_s2 = smov %s3602_s11  ;;  %s2968_s3 = scalar_lea.hbm %s3602_s11, %s1727_s8 }
  0xd3   : > { %s2163_s7 = scalar_lea.hbm %s2968_s3, 512  ;;  %s2168_s16 = scalar_lea.hbm %s3603_s2, 2048 }
  0xd4   : > { %p2164_p6 = scmp.ne.s32.totalorder %s2968_s3, %s2163_s7  ;;  %p2169_p3 = scmp.lt.u32.totalorder %s2968_s3, %s3603_s2 }
  0xd5   : > { %p2170_p0 = scmp.lt.u32.totalorder %s2168_s16, %s2163_s7  ;;  %p2172_p2 = scmp.lt.u32.totalorder %s2163_s7, %s2968_s3 }
  0xd6   : > { %p2166_p9 = pnand %p2164_p6, %p2843_p4 }
  0xd7   : > { %p2171_p13 = por %p2170_p0, %p2169_p3 }
  0xd8   : > { %p2167_p7 = pneg %p2166_p9 }
  0xd9   : > { %p2173_p1 = por %p2172_p2, %p2171_p13 }
  0xdb   : > { %p2174_p8 = pnand %p2173_p1, %p2167_p7 }
  0xdd   : > { %2177 = shalt.err (!%p2174_p8)
}
  0xde   : > { %s2178_s5 = scalar_lea.vmem %s2821_s24, 512  ;;  %s2482_s11 = smov [#allocation8]  }
  0xdf   : > { %p2179_p5 = scmp.ne.s32.totalorder %s2821_s24, %s2178_s5  ;;  %s2183_s10 = sshll.u32 %s2482_s11, 4  ;;  %s2184_s10 = int_to_ptr.vmem [resolvable:$false] %s2183_s10 }
  0xe0   : > { %s2185_s18 = scalar_lea.vmem %s2184_s10, 1024  ;;  %p2186_p10 = scmp.lt.s32.totalorder %s2821_s24, %s2184_s10 }
  0xe1   : > { %p2181_p11 = pnand %p2179_p5, %p2843_p4  ;;  %p2187_p6 = scmp.lt.s32.totalorder %s2185_s18, %s2178_s5 }
  0xe3   : > { %p2182_p12 = pneg %p2181_p11  ;;  %p2188_p9 = por %p2187_p6, %p2186_p10 }
  0xe5   : > { %p2189_p3 = pnand %p2188_p9, %p2182_p12 }
  0xe7   : > { %2192 = shalt.err (!%p2189_p3)
}
  0xe8   : > { %s2483_s16 = smov 256   ;;  %p3604_p7 = scmp.ne.s32.totalorder %s3581_s0, 0 }
  0xe9   : > { %s3605_s4 = scalar_lea.sflag [#allocation7], %s2683_s17  ;;  %s3606_s21 = sld [smem:[#allocation29_spill]] }
  0xea   : > { %s3607_s8 = sld [smem:[#allocation28_spill]]  ;;  %s3608_s13 = sld [smem:[#allocation27_spill]] }
  0xeb   : > { %s3609_s7 = sld [smem:[#allocation41_spill]]  ;;  %s176_s0 = sor.u32 %s2775_s29, %s2674_s6 }
  0xec   : > { %1844 = dma.hbm_to_vmem [thread:$0]  (!%p3604_p7), %s2968_s3, 512, %s2821_s24, %s3605_s4, %s2483_s16, %s3600_s1, %s3599_s30  }
  0xed   : > { %p177_p4 = scmp.eq.s32.totalorder %s176_s0, 0  ;;  %p3610_p2 = scmp.eq.s32.totalorder %s2473_s12, 0 }
  0xee   : > { %s3613_s10 = sld [smem:[#allocation52_spill]]  ;;  %p3614_p11 = scmp.lt.s32.totalorder %s2473_s12, 4 }
  0xef   : > { %s179_s9 = sadd.s32 1, %s3606_s21  ;;  %s490_s28 = sand.u32 1, %s3606_s21  }
  0xf0   : > { %p186_p0 = scmp.ne.s32.totalorder %s3606_s21, %s3607_s8  ;;  %p192_p13 = scmp.ne.s32.totalorder %s3607_s8, %s3608_s13 }
  0xf1   : > { %s3003_s22 = scalar_select %p177_p4, %s3606_s21, %s179_s9  }
  0xf2   : > { %p188_p1 = por %p186_p0, %p3610_p2  ;;  %p3611_p8 = scmp.eq.s32.totalorder %s3609_s7, 0 }
  0xf3   : > { %s3018_s24 = sshll.u32 %s490_s28, 3 }
  0xf4   : > { %p3009_p5 = por %p192_p13, %p3611_p8  ;;  %s1515_s18 = scalar_lea.hbm %s3613_s10, %s2828_s15 }
  0xf5   : > { %s3020_s6 = scalar_lea.hbm %s1515_s18, 512  ;;  %p3024_p12 = pnand %p3614_p11, %p188_p1 }
  0xf6   : > { %s3612_s14 = scalar_select %p3009_p5, 1, 0 }
  0xf7   : > { %s492_s30 = scalar_lea.vmem [#allocation11], %s3018_s24  ;;  %s2223_s3 = scalar_lea.hbm %s1515_s18, 640 }
  0xf8   : > { %s502_s1 = sshll.u32 %s492_s30, 4  ;;  %p2194_p10 = scmp.ne.s32.totalorder %s3020_s6, %s2223_s3  ;;  %s503_s1 = int_to_ptr.vmem [resolvable:$true] %s502_s1 }
  0xf9   : > { %p2195_p6 = pneg %p3024_p12  ;;  %s2198_s21 = scalar_lea.hbm %s3613_s10, 1024 }
  0xfa   : > { %p2199_p7 = scmp.lt.u32.totalorder %s3020_s6, %s3613_s10  ;;  %p2200_p4 = scmp.lt.u32.totalorder %s2198_s21, %s2223_s3 }
  0xfb   : > { %p2196_p9 = pnand %p2195_p6, %p2194_p10  ;;  %p2202_p13 = scmp.lt.u32.totalorder %s2223_s3, %s3020_s6 }
  0xfc   : > { %p2201_p0 = por %p2200_p4, %p2199_p7 }
  0xfd   : > { %p2197_p3 = pneg %p2196_p9 }
  0xfe   : > { %p2203_p2 = por %p2202_p13, %p2201_p0 }
 0x100   : > { %p2204_p1 = pnand %p2203_p2, %p2197_p3 }
 0x102   : > { %2207 = shalt.err (!%p2204_p1)
}
 0x103   : > { %s2208_s7 = scalar_lea.vmem %s503_s1, 128  ;;  %s2484_s0 = smov [#allocation11]  }
 0x104   : > { %p2209_p8 = scmp.ne.s32.totalorder %s503_s1, %s2208_s7  ;;  %s2213_s9 = sshll.u32 %s2484_s0, 4  ;;  %s2214_s9 = int_to_ptr.vmem [resolvable:$false] %s2213_s9 }
 0x105   : > { %s2215_s28 = scalar_lea.vmem %s2214_s9, 256  ;;  %p2216_p9 = scmp.lt.s32.totalorder %s503_s1, %s2214_s9 }
 0x106   : > { %p2211_p11 = pnand %p2209_p8, %p2195_p6  ;;  %p2217_p5 = scmp.lt.s32.totalorder %s2215_s28, %s2208_s7 }
 0x108   : > { %p2212_p10 = pneg %p2211_p11  ;;  %p2218_p4 = por %p2217_p5, %p2216_p9 }
 0x10a   : > { %p2219_p7 = pnand %p2218_p4, %p2212_p10 }
 0x10c   : > { %2222 = shalt.err (!%p2219_p7)
}
 0x10d   : > { %s3616_s5 = scalar_lea.sflag [#allocation10], %s2683_s17  ;;  %s3617_s30 = sld [smem:[#allocation54_spill]] }
 0x10e   : > { %1850 = dma.hbm_to_vmem [thread:$0]  (!%p3024_p12), %s3020_s6, 128, %s503_s1, %s3616_s5  }
 0x10f   : > { %s533_s4 = scalar_lea.vmem [#allocation14], %s3018_s24 }
 0x110   : > { %s543_s21 = sshll.u32 %s533_s4, 4  ;;  %s544_s21 = int_to_ptr.vmem [resolvable:$true] %s543_s21 }
 0x113   : > { %s3618_s3 = smov %s3617_s30  ;;  %s1530_s16 = scalar_lea.hbm %s3617_s30, %s2828_s15 }
 0x114   : > { %s1531_s8 = scalar_lea.hbm %s1530_s16, 512  ;;  %s2254_s13 = scalar_lea.hbm %s1530_s16, 640 }
 0x115   : > { %p2225_p5 = scmp.ne.s32.totalorder %s1531_s8, %s2254_s13  ;;  %s2229_s9 = scalar_lea.hbm %s3618_s3, 1024 }
 0x116   : > { %p2230_p13 = scmp.lt.u32.totalorder %s1531_s8, %s3618_s3  ;;  %p2231_p2 = scmp.lt.u32.totalorder %s2229_s9, %s2254_s13 }
 0x117   : > { %p2227_p3 = pnand %p2225_p5, %p2195_p6  ;;  %p2233_p8 = scmp.lt.u32.totalorder %s2254_s13, %s1531_s8 }
 0x118   : > { %p2232_p1 = por %p2231_p2, %p2230_p13 }
 0x119   : > { %p2228_p0 = pneg %p2227_p3 }
 0x11a   : > { %p2234_p11 = por %p2233_p8, %p2232_p1 }
 0x11c   : > { %p2235_p10 = pnand %p2234_p11, %p2228_p0 }
 0x11e   : > { %2238 = shalt.err (!%p2235_p10)
}
 0x11f   : > { %s2239_s15 = scalar_lea.vmem %s544_s21, 128  ;;  %s2485_s24 = smov [#allocation14]  }
 0x120   : > { %p2240_p9 = scmp.ne.s32.totalorder %s544_s21, %s2239_s15  ;;  %s2244_s1 = sshll.u32 %s2485_s24, 4  ;;  %s2245_s1 = int_to_ptr.vmem [resolvable:$false] %s2244_s1 }
 0x121   : > { %s2246_s5 = scalar_lea.vmem %s2245_s1, 256  ;;  %p2247_p5 = scmp.lt.s32.totalorder %s544_s21, %s2245_s1 }
 0x122   : > { %p2242_p4 = pnand %p2240_p9, %p2195_p6  ;;  %p2248_p3 = scmp.lt.s32.totalorder %s2246_s5, %s2239_s15 }
 0x124   : > { %p2243_p7 = pneg %p2242_p4  ;;  %p2249_p2 = por %p2248_p3, %p2247_p5 }
 0x126   : > { %p2250_p13 = pnand %p2249_p2, %p2243_p7 }
 0x128   : > { %2253 = shalt.err (!%p2250_p13)
}
 0x129   : > { %s3619_s11 = scalar_lea.sflag [#allocation13], %s2683_s17  ;;  %p3620_p0 = scmp.ne.s32.totalorder %s3566_s26, 0 }
 0x12a   : > { %1856 = dma.hbm_to_vmem [thread:$0]  (!%p3024_p12), %s1531_s8, 128, %s544_s21, %s3619_s11  }
 0x12b   : > { %558 = sbr.rel (%p3620_p0) target bundleno = 764 (0x2fc), region = 60  ;;  %s3621_s18 = sld [smem:[#allocation33_spill]] (!%p3620_p0) }
 0x12c   : > { %p3622_p6 = scmp.ne.s32.totalorder (!%p3620_p0), %s3596_s19, 0 }
 0x131   : > { %s560_s30 = sand.u32 (!%p3620_p0), 1, %s3621_s18  }
 0x132   : > { %s3075_s16 = sshll.u32 %s560_s30, 4  ;;  %s561_s4 = scalar_lea.sflag [#allocation4], %s560_s30 }
 0x133   : > { %s564_s13 = scalar_lea.vmem [#allocation3], %s3075_s16 }
 0x134   : > { %2364 = dma.done.wait (%p3622_p6), %s561_s4, 256  }
 0x135   : > { %2366 = vsyncadd (%p3622_p6), %s561_s4, 4294967040  ;;  %s3623_s29 = sld [smem:[#allocation41_spill]]  ;;  %s571_s21 = sand.u32 1, %s2437_s23  }
 0x136   : > { %s3084_s26 = sshll.u32 %s571_s21, 4  ;;  %p3624_p12 = scmp.ne.s32.totalorder %s3569_s27, 0 }
 0x137   : > { %s573_s7 = scalar_lea.vmem [#allocation6], %s3084_s26 }
 0x13b   : > { %s569_s17 = sand.u32 1, %s3623_s29  }
 0x13c   : > { %s570_s8 = scalar_lea.sflag [#allocation7], %s569_s17 }
 0x13d   : > { %2368 = dma.done.wait (%p3624_p12), %s570_s8, 256  }
 0x13e   : > { %2370 = vsyncadd (%p3624_p12), %s570_s8, 4294967040  ;;  %s580_s0 = sand.u32 1, %s2425_s20   ;;  %p3625_p1 = scmp.ne.s32.totalorder %s3573_s25, 0 }
 0x13f   : > { %s1743_s19 = sshll.u32 %s580_s0, 5 }
 0x140   : > { %s3092_s9 = scalar_lea.vmem [#allocation8], %s1743_s19 }
 0x141   : > { %2372 = dma.done.wait (%p3625_p1), %s570_s8, 512  }
 0x142   : > { %2374 = vsyncadd (%p3625_p1), %s570_s8, 4294966784  ;;  %s3098_s28 = sshll.u32 %s580_s0, 3  ;;  %s588_s6 = scalar_lea.sflag [#allocation10], %s569_s17 }
 0x143   : > { %s591_s15 = scalar_lea.vmem [#allocation9], %s3098_s28 }
 0x144   : > { %2376 = dma.done.wait (%p3625_p1), %s588_s6, 128  }
 0x145   : > { %2378 = vsyncadd (%p3625_p1), %s588_s6, 4294967168  ;;  %s3626_s27 = sld [smem:[#allocation28_spill]]  ;;  %p3627_p8 = scmp.ne.s32.totalorder %s3612_s14, 0 }
 0x14b   : > { %s598_s24 = sand.u32 1, %s3626_s27  }
 0x14c   : > { %s3106_s1 = sshll.u32 %s598_s24, 3 }
 0x14d   : > { %s600_s5 = scalar_lea.vmem [#allocation11], %s3106_s1 }
 0x14e   : > { %2380 = dma.done.wait (%p3627_p8), %s588_s6, 128  }
 0x14f   : > { %2382 = vsyncadd (%p3627_p8), %s588_s6, 4294967168  ;;  %s606_s11 = scalar_lea.sflag [#allocation13], %s569_s17  ;;  %s609_s18 = scalar_lea.vmem [#allocation12], %s3098_s28 }
 0x150   : > { %2384 = dma.done.wait (%p3625_p1), %s606_s11, 128  }
 0x151   : > { %2386 = vsyncadd (%p3625_p1), %s606_s11, 4294967168  ;;  %s618_s30 = scalar_lea.vmem [#allocation14], %s3106_s1 }
 0x152   : > { %2388 = dma.done.wait (%p3627_p8), %s606_s11, 128  }
 0x153   : > { %2390 = vsyncadd (%p3627_p8), %s606_s11, 4294967168  ;;  %s3628_s4 = sld [smem:[#allocation25_spill]]  ;;  %s3629_s29 = sld [smem:[#allocation36_spill]] }
 0x154   : > { %s3630_s0 = sld [smem:[#allocation57_spill]]  ;;  %s3631_s27 = sld [smem:[#allocation35_spill]] }
 0x159   : > { %s695_s21 = sand.u32 1, %s3628_s4   ;;  %p716_p11 = scmp.lt.s32.totalorder %s3629_s29, 1 }
 0x15a   : > { %s1748_s17 = sshll.u32 %s695_s21, 4  ;;  %p1749_p10 = scmp.ne.s32.totalorder %s3631_s27, 0 }
 0x15b   : > { %s3680_s29 = smov (!%p716_p11, %s3629_s29), 1  ;;  %s3134_s6 = scalar_lea.vmem [#allocation15], %s1748_s17  ;;  %v2486_v0 = vmov (!%p1749_p10), 0.0  }
 0x15c   : > { %s718_s19 = scalar_lea.vmem %s3630_s0, %s3680_s29  ;;  %724 = sbr.rel (%p1749_p10) target bundleno = 355 (0x163), region = 92  ;;  %725 = vst [vmem:[#allocation2] sm:$0xff] (!%p1749_p10), %v2486_v0  ;;  %726 = vst [vmem:[#allocation2 + $0x8] sm:$0xff] (!%p1749_p10), %v2486_v0 }
 0x163 PF: > { %s3632_s11 = sld [smem:[#allocation56_spill]]  ;;  %v761_v2 = vld [vmem:[%s3092_s9] sm:$0xff]  ;;  %v867_v3 = vlaneseq  ;;  %v2487_v4 = vmov 0   ;;  %v2488_v5 = vmov 0.0   ;;  %v3142_v8 = vld [vmem:[%s618_s30] sm:$0xff]  ;;  %v3171_v27 = vld [vmem:[%s3092_s9 + $0x8] sm:$0xff] }
 0x164   : > { %2036 = vset.pattern.permute.xlu0 %v2487_v4  ;;  %1775 = vmatprep.subr.bf16.mxu0 %v2488_v5  ;;  %v765_v6 = vunpack.c.0.s8 %v761_v2  ;;  %v766_v7 = vunpack.c.1.s8 %v761_v2  ;;  %v3146_v9 = vld [vmem:[%s600_s5] sm:$0xff]  ;;  %v767_v10 = vunpack.c.2.s8 %v761_v2  ;;  %v2489_v12 = vmov 1966171168   ;;  %v3158_v21 = vld [vmem:[%s609_s18] sm:$0xff]  ;;  %s3634_s16 = sld [smem:[#allocation35_spill]] }
 0x165   : > { %1795 = vmatprep.subr.bf16.mxu1 %v2488_v5  ;;  %v865_v13 = vunpack.c.l.s4 %v2489_v12  ;;  %v868_v14 = vshrl.u32 %v867_v3, 7  ;;  %v1085_v15 = vcombine.high %v3142_v8, %v3142_v8  ;;  %v1192_v16 = vcombine.high %v3146_v9, %v3146_v9  ;;  %v3162_v22 = vld [vmem:[%s591_s15] sm:$0xff] }
 0x166   : > { %v829_v17 = vand.u32 15, %v765_v6  ;;  %v830_v18 = vand.u32 15, %v766_v7  ;;  %v781_v19 = vshra.s32 %v765_v6, 4  ;;  %v782_v20 = vshra.s32 %v766_v7, 4 }
 0x167   : > { %v866_v23 = vunpack.c.0.s8 %v865_v13  ;;  %v3164_v24 = vsub.s32 0, %v868_v14  ;;  %v863_v25 = vcombine.high %v3158_v21, %v3158_v21  ;;  %v970_v26 = vcombine.high %v3162_v22, %v3162_v22 }
 0x168   : > { %v845_v28 = vcvt.s32.f32 %v829_v17  ;;  %v846_v29 = vcvt.s32.f32 %v830_v18  ;;  %v797_v30 = vand.u32 15, %v781_v19  ;;  %v798_v31 = vand.u32 15, %v782_v20 }
 0x169   : > { %s3633_s4 = smov %s3632_s11  ;;  %v727_v1 = vld [vmem:[%s3632_s11] sm:$0xff]  ;;  %v3173_v32 = vsub.s32 %v866_v23, %v868_v14  ;;  %v768_v33 = vunpack.c.3.s8 %v761_v2  ;;  %v831_v34 = vand.u32 15, %v767_v10  ;;  %v783_v35 = vshra.s32 %v767_v10, 4 }
 0x16a   : > { %733 = vperm.xlu0 %2036, %v727_v1   ;;  %v728_v11 = vld [vmem:[%s3633_s4 + $0x8] sm:$0xff]  ;;  %v813_v36 = vcvt.s32.f32 %v797_v30  ;;  %v814_v37 = vcvt.s32.f32 %v798_v31  ;;  %v769_v38 = vunpack.c.0.s8 %v3171_v27  ;;  %v770_v39 = vunpack.c.1.s8 %v3171_v27  ;;  %p1750_p9 = scmp.ne.s32.totalorder %s3634_s16, 1 }
 0x16b   : > { %v1092_v40 = vrot.slane %v3142_v8, %v3173_v32  ;;  %v1199_v41 = vrot.slane %v3146_v9, %v3173_v32  ;;  %v870_v42 = vrot.slane %v3158_v21, %v3173_v32  ;;  %v977_v43 = vrot.slane %v3162_v22, %v3173_v32 }
 0x16c   : > { %v832_v44 = vand.u32 15, %v768_v33  ;;  %v847_v45 = vcvt.s32.f32 %v831_v34  ;;  %v784_v46 = vshra.s32 %v768_v33, 4  ;;  %v799_v47 = vand.u32 15, %v783_v35 }
 0x16d   : > { %v1100_v48 = vcombine.high %v1092_v40, %v1092_v40  ;;  %v1108_v49 = vrot.slane %v1092_v40, %v3173_v32  ;;  %v1207_v50 = vcombine.high %v1199_v41, %v1199_v41  ;;  %v1215_v51 = vrot.slane %v1199_v41, %v3173_v32 }
 0x16e   : > { %738 = vperm.xlu0 %2036, %v728_v11   ;;  %v878_v52 = vcombine.high %v870_v42, %v870_v42  ;;  %v886_v53 = vrot.slane %v870_v42, %v3173_v32  ;;  %v985_v54 = vcombine.high %v977_v43, %v977_v43  ;;  %v993_v55 = vrot.slane %v977_v43, %v3173_v32 }
 0x16f   : > { %v1130_v56 = vcombine.high %v1108_v49, %v1108_v49  ;;  %v1137_v57 = vrot.slane %v1108_v49, %v3164_v24  ;;  %v1237_v58 = vcombine.high %v1215_v51, %v1215_v51  ;;  %v1244_v59 = vrot.slane %v1215_v51, %v3164_v24 }
 0x170   : > { %v908_v60 = vcombine.high %v886_v53, %v886_v53  ;;  %v915_v61 = vrot.slane %v886_v53, %v3164_v24  ;;  %v1015_v62 = vcombine.high %v993_v55, %v993_v55  ;;  %v1022_v63 = vrot.slane %v993_v55, %v3164_v24 }
 0x171   : > { %v1174_v0 = vsub.f32 %v845_v28, %v1137_v57  ;;  %v1175_v1 = vsub.f32 %v846_v29, %v1137_v57  ;;  %v848_v2 = vcvt.s32.f32 %v832_v44  ;;  %v3194_v3 = vrot.slane %v1100_v48, %v3173_v32 }
 0x172   : > { %v952_v4 = vsub.f32 %v813_v36, %v915_v61  ;;  %v953_v6 = vsub.f32 %v814_v37, %v915_v61  ;;  %v3197_v7 = vrot.slane %v1207_v50, %v3173_v32  ;;  %v800_v10 = vand.u32 15, %v784_v46 }
 0x173   : > { %v1281_v11 = vmul.f32 %v1244_v59, %v1174_v0  ;;  %v1282_v12 = vmul.f32 %v1244_v59, %v1175_v1  ;;  %v1141_v13 = vrot.slane %v3194_v3, %v3164_v24  ;;  %v815_v14 = vcvt.s32.f32 %v799_v47 }
 0x174   : > { %v1059_v17 = vmul.f32 %v1022_v63, %v952_v4  ;;  %v1060_v18 = vmul.f32 %v1022_v63, %v953_v6  ;;  %v1248_v19 = vrot.slane %v3197_v7, %v3164_v24  ;;  %v816_v20 = vcvt.s32.f32 %v800_v10 }
 0x175   : > { %v1297_v23 = vpack.c.bf16 %v1282_v12, %v1281_v11  ;;  %v1176_v28 = vsub.f32 %v847_v45, %v1141_v13  ;;  %v1177_v29 = vsub.f32 %v848_v2, %v1141_v13  ;;  %v3204_v30 = vrot.slane %v878_v52, %v3173_v32 }
 0x176   : > { %v1075_v31 = vpack.c.bf16 %v1060_v18, %v1059_v17  ;;  %v3207_v33 = vrot.slane %v985_v54, %v3173_v32  ;;  %v833_v34 = vand.u32 15, %v769_v38  ;;  %v834_v35 = vand.u32 15, %v770_v39  ;;  %v3238_v17 = vld [vmem:[%s3092_s9 + $0x10] sm:$0xff] }
 0x177   : > { %1776 = vmatpush3.bf16.msra.mxu0 %v1297_v23  ;;  %v1283_v36 = vmul.f32 %v1248_v19, %v1176_v28  ;;  %v1284_v37 = vmul.f32 %v1248_v19, %v1177_v29  ;;  %v919_v40 = vrot.slane %v3204_v30, %v3164_v24  ;;  %v1145_v41 = vrot.slane %v1130_v56, %v3164_v24 }
 0x178   : > { %1796 = vmatpush3.bf16.msra.mxu1 %v1075_v31  ;;  %1777 = vmatprep.subr.bf16.mxu0 %v2488_v5  ;;  %v1026_v42 = vrot.slane %v3207_v33, %v3164_v24  ;;  %v849_v43 = vcvt.s32.f32 %v833_v34  ;;  %v850_v44 = vcvt.s32.f32 %v834_v35  ;;  %v1252_v45 = vrot.slane %v1237_v58, %v3164_v24 }
 0x179   : > { %1797 = vmatprep.subr.bf16.mxu1 %v2488_v5  ;;  %v1298_v46 = vpack.c.bf16 %v1284_v37, %v1283_v36  ;;  %v954_v47 = vsub.f32 %v815_v14, %v919_v40  ;;  %v955_v48 = vsub.f32 %v816_v20, %v919_v40  ;;  %v785_v49 = vshra.s32 %v769_v38, 4 }
 0x17a   : > { %v1178_v50 = vsub.f32 %v849_v43, %v1145_v41  ;;  %v1179_v51 = vsub.f32 %v850_v44, %v1145_v41  ;;  %v786_v52 = vshra.s32 %v770_v39, 4  ;;  %v923_v53 = vrot.slane %v908_v60, %v3164_v24 }
 0x17b   : > { %1778 = vmatpush3.bf16.msra.mxu0 %v1298_v46  ;;  %v1061_v54 = vmul.f32 %v1026_v42, %v954_v47  ;;  %v1062_v55 = vmul.f32 %v1026_v42, %v955_v48  ;;  %v801_v56 = vand.u32 15, %v785_v49  ;;  %v1030_v57 = vrot.slane %v1015_v62, %v3164_v24 }
 0x17c   : > { %1779 = vmatprep.subr.bf16.mxu0 %v2488_v5  ;;  %v1285_v58 = vmul.f32 %v1252_v45, %v1178_v50  ;;  %v1286_v59 = vmul.f32 %v1252_v45, %v1179_v51  ;;  %v802_v61 = vand.u32 15, %v786_v52  ;;  %v771_v38 = vunpack.c.2.s8 %v3171_v27 }
 0x17d   : > { %v1076_v63 = vpack.c.bf16 %v1062_v55, %v1061_v54  ;;  %v817_v0 = vcvt.s32.f32 %v801_v56  ;;  %v772_v1 = vunpack.c.3.s8 %v3171_v27  ;;  %v1132_v39 = vcombine.high %v3194_v3, %v3194_v3 }
 0x17e   : > { %v1299_v60 = vpack.c.bf16 %v1286_v59, %v1285_v58  ;;  %v818_v2 = vcvt.s32.f32 %v802_v61  ;;  %v835_v4 = vand.u32 15, %v771_v38  ;;  %v1239_v62 = vcombine.high %v3197_v7, %v3197_v7 }
 0x17f   : > { %1798 = vmatpush3.bf16.msra.mxu1 %v1076_v63  ;;  %v956_v6 = vsub.f32 %v817_v0, %v923_v53  ;;  %v836_v10 = vand.u32 15, %v772_v1  ;;  %v1149_v11 = vrot.slane %v1132_v39, %v3164_v24  ;;  %v787_v12 = vshra.s32 %v771_v38, 4 }
 0x180   : > { %1799 = vmatprep.subr.bf16.mxu1 %v2488_v5  ;;  %1780 = vmatpush3.bf16.msra.mxu0 %v1299_v60  ;;  %v957_v27 = vsub.f32 %v818_v2, %v923_v53  ;;  %v851_v13 = vcvt.s32.f32 %v835_v4  ;;  %v1256_v3 = vrot.slane %v1239_v62, %v3164_v24  ;;  %v788_v14 = vshra.s32 %v772_v1, 4 }
 0x181   : > { %v1063_v18 = vmul.f32 %v1030_v57, %v956_v6  ;;  %1781 = vmatprep.subr.bf16.mxu0 %v2488_v5  ;;  %v852_v7 = vcvt.s32.f32 %v836_v10  ;;  %v803_v19 = vand.u32 15, %v787_v12  ;;  %v910_v20 = vcombine.high %v3204_v30, %v3204_v30 }
 0x182   : > { %v1064_v23 = vmul.f32 %v1030_v57, %v957_v27  ;;  %v1180_v28 = vsub.f32 %v851_v13, %v1149_v11  ;;  %v804_v29 = vand.u32 15, %v788_v14  ;;  %v1017_v31 = vcombine.high %v3207_v33, %v3207_v33 }
 0x183   : > { %v1181_v34 = vsub.f32 %v852_v7, %v1149_v11  ;;  %v819_v35 = vcvt.s32.f32 %v803_v19  ;;  %v927_v36 = vrot.slane %v910_v20, %v3164_v24  ;;  %v773_v37 = vunpack.c.0.s8 %v3238_v17 }
 0x184   : > { %v1077_v40 = vpack.c.bf16 %v1064_v23, %v1063_v18  ;;  %v1287_v41 = vmul.f32 %v1256_v3, %v1180_v28  ;;  %v820_v42 = vcvt.s32.f32 %v804_v29  ;;  %v1034_v43 = vrot.slane %v1017_v31, %v3164_v24  ;;  %v3299_v31 = vld [vmem:[%s3092_s9 + $0x18] sm:$0xff] }
 0x185   : > { %v1288_v44 = vmul.f32 %v1256_v3, %v1181_v34  ;;  %v958_v45 = vsub.f32 %v819_v35, %v927_v36  ;;  %v774_v30 = vunpack.c.1.s8 %v3238_v17  ;;  %v837_v46 = vand.u32 15, %v773_v37 }
 0x186   : > { %1800 = vmatpush3.bf16.msra.mxu1 %v1077_v40  ;;  %v959_v47 = vsub.f32 %v820_v42, %v927_v36  ;;  %v1099_v33 = vrot.slane %v1085_v15, %v3173_v32  ;;  %v1206_v48 = vrot.slane %v1192_v16, %v3173_v32  ;;  %v789_v49 = vshra.s32 %v773_v37, 4 }
 0x187   : > { %1801 = vmatprep.subr.bf16.mxu1 %v2488_v5  ;;  %v1300_v50 = vpack.c.bf16 %v1288_v44, %v1287_v41  ;;  %v1065_v51 = vmul.f32 %v1034_v43, %v958_v45  ;;  %v838_v52 = vand.u32 15, %v774_v30  ;;  %v853_v53 = vcvt.s32.f32 %v837_v46 }
 0x188   : > { %v1066_v54 = vmul.f32 %v1034_v43, %v959_v47  ;;  %v3259_v55 = vrot.slane %v1099_v33, %v3173_v32  ;;  %v3262_v56 = vrot.slane %v1206_v48, %v3173_v32  ;;  %v790_v8 = vshra.s32 %v774_v30, 4 }
 0x189   : > { %1782 = vmatpush3.bf16.msra.mxu0 %v1300_v50  ;;  %v854_v15 = vcvt.s32.f32 %v838_v52  ;;  %v805_v57 = vand.u32 15, %v789_v49  ;;  %v877_v9 = vrot.slane %v863_v25, %v3173_v32  ;;  %v984_v16 = vrot.slane %v970_v26, %v3173_v32 }
 0x18a   : > { %v1078_v58 = vpack.c.bf16 %v1066_v54, %v1065_v51  ;;  %1783 = vmatprep.subr.bf16.mxu0 %v2488_v5  ;;  %v1153_v59 = vrot.slane %v3259_v55, %v3164_v24  ;;  %v1260_v61 = vrot.slane %v3262_v56, %v3164_v24  ;;  %v806_v38 = vand.u32 15, %v790_v8 }
 0x18b   : > { %v821_v63 = vcvt.s32.f32 %v805_v57  ;;  %v3278_v0 = vrot.slane %v877_v9, %v3173_v32  ;;  %v3281_v21 = vrot.slane %v984_v16, %v3173_v32  ;;  %v775_v22 = vunpack.c.2.s8 %v3238_v17 }
 0x18c   : > { %1802 = vmatpush3.bf16.msra.mxu1 %v1078_v58  ;;  %v1182_v25 = vsub.f32 %v853_v53, %v1153_v59  ;;  %v1183_v26 = vsub.f32 %v854_v15, %v1153_v59  ;;  %v822_v1 = vcvt.s32.f32 %v806_v38  ;;  %v776_v39 = vunpack.c.3.s8 %v3238_v17 }
 0x18d   : > { %1803 = vmatprep.subr.bf16.mxu1 %v2488_v5  ;;  %v931_v60 = vrot.slane %v3278_v0, %v3164_v24  ;;  %v1038_v2 = vrot.slane %v3281_v21, %v3164_v24  ;;  %v839_v4 = vand.u32 15, %v775_v22  ;;  %v1101_v62 = vcombine.high %v1099_v33, %v1099_v33 }
 0x18e   : > { %v1289_v6 = vmul.f32 %v1260_v61, %v1182_v25  ;;  %v1290_v10 = vmul.f32 %v1260_v61, %v1183_v26  ;;  %v840_v11 = vand.u32 15, %v776_v39  ;;  %v1208_v12 = vcombine.high %v1206_v48, %v1206_v48 }
 0x18f   : > { %v960_v27 = vsub.f32 %v821_v63, %v931_v60  ;;  %v961_v13 = vsub.f32 %v822_v1, %v931_v60  ;;  %v855_v3 = vcvt.s32.f32 %v839_v4  ;;  %v3291_v14 = vrot.slane %v1101_v62, %v3173_v32 }
 0x190   : > { %v1301_v17 = vpack.c.bf16 %v1290_v10, %v1289_v6  ;;  %v856_v18 = vcvt.s32.f32 %v840_v11  ;;  %v3294_v7 = vrot.slane %v1208_v12, %v3173_v32  ;;  %v791_v19 = vshra.s32 %v775_v22, 4 }
 0x191   : > { %v1067_v20 = vmul.f32 %v1038_v2, %v960_v27  ;;  %v1068_v23 = vmul.f32 %v1038_v2, %v961_v13  ;;  %v1157_v28 = vrot.slane %v3291_v14, %v3164_v24  ;;  %v792_v29 = vshra.s32 %v776_v39, 4 }
 0x192   : > { %1784 = vmatpush3.bf16.msra.mxu0 %v1301_v17  ;;  %v1264_v34 = vrot.slane %v3294_v7, %v3164_v24  ;;  %v807_v35 = vand.u32 15, %v791_v19  ;;  %v879_v36 = vcombine.high %v877_v9, %v877_v9  ;;  %v986_v37 = vcombine.high %v984_v16, %v984_v16 }
 0x193   : > { %v1079_v40 = vpack.c.bf16 %v1068_v23, %v1067_v20  ;;  %1785 = vmatprep.subr.bf16.mxu0 %v2488_v5  ;;  %v1184_v41 = vsub.f32 %v855_v3, %v1157_v28  ;;  %v1185_v42 = vsub.f32 %v856_v18, %v1157_v28  ;;  %v808_v43 = vand.u32 15, %v792_v29 }
 0x194   : > { %v823_v44 = vcvt.s32.f32 %v807_v35  ;;  %v3305_v45 = vrot.slane %v879_v36, %v3173_v32  ;;  %v3308_v30 = vrot.slane %v986_v37, %v3173_v32  ;;  %v777_v46 = vunpack.c.0.s8 %v3299_v31 }
 0x195   : > { %1804 = vmatpush3.bf16.msra.mxu1 %v1079_v40  ;;  %v1291_v47 = vmul.f32 %v1264_v34, %v1184_v41  ;;  %v1292_v33 = vmul.f32 %v1264_v34, %v1185_v42  ;;  %v824_v48 = vcvt.s32.f32 %v808_v43  ;;  %v778_v49 = vunpack.c.1.s8 %v3299_v31 }
 0x196   : > { %1805 = vmatprep.subr.bf16.mxu1 %v2488_v5  ;;  %v935_v50 = vrot.slane %v3305_v45, %v3164_v24  ;;  %v1042_v51 = vrot.slane %v3308_v30, %v3164_v24  ;;  %v841_v52 = vand.u32 15, %v777_v46  ;;  %v1131_v32 = vcombine.high %v3259_v55, %v3259_v55 }
 0x197   : > { %v1302_v53 = vpack.c.bf16 %v1292_v33, %v1291_v47  ;;  %v842_v54 = vand.u32 15, %v778_v49  ;;  %v1238_v8 = vcombine.high %v3262_v56, %v3262_v56  ;;  %v793_v15 = vshra.s32 %v777_v46, 4 }
 0x198   : > { %v962_v57 = vsub.f32 %v823_v44, %v935_v50  ;;  %v963_v9 = vsub.f32 %v824_v48, %v935_v50  ;;  %v857_v16 = vcvt.s32.f32 %v841_v52  ;;  %v1161_v58 = vrot.slane %v1131_v32, %v3164_v24 }
 0x199   : > { %1786 = vmatpush3.bf16.msra.mxu0 %v1302_v53  ;;  %v858_v59 = vcvt.s32.f32 %v842_v54  ;;  %v1268_v61 = vrot.slane %v1238_v8, %v3164_v24  ;;  %v794_v38 = vshra.s32 %v778_v49, 4  ;;  %v809_v63 = vand.u32 15, %v793_v15  ;;  %v729_v53 = vld [vmem:[%s564_s13] sm:$0xff] }
 0x19a   : > { %v1069_v22 = vmul.f32 %v1042_v51, %v962_v57  ;;  %v1070_v25 = vmul.f32 %v1042_v51, %v963_v9  ;;  %1787 = vmatprep.subr.bf16.mxu0 %v2488_v5  ;;  %v1186_v55 = vsub.f32 %v857_v16, %v1161_v58  ;;  %v909_v56 = vcombine.high %v3278_v0, %v3278_v0  ;;  %v750_v54 = vld [vmem:[%s573_s7] sm:$0xff]  ;;  %v730_v57 = vld [vmem:[%s564_s13 + $0x8] sm:$0xff] }
 0x19b   : > { %v1187_v26 = vsub.f32 %v858_v59, %v1161_v58  ;;  %v810_v1 = vand.u32 15, %v794_v38  ;;  %v825_v39 = vcvt.s32.f32 %v809_v63  ;;  %v1016_v60 = vcombine.high %v3281_v21, %v3281_v21  ;;  %v751_v9 = vld [vmem:[%s573_s7 + $0x8] sm:$0xff]  ;;  %s3635_s7 = sld [smem:[#allocation55_spill]] (!%p1750_p9) }
 0x19c   : > { %v1080_v2 = vpack.c.bf16 %v1070_v25, %v1069_v22  ;;  %v1293_v4 = vmul.f32 %v1268_v61, %v1186_v55  ;;  %v939_v62 = vrot.slane %v909_v56, %v3164_v24  ;;  %v779_v6 = vunpack.c.2.s8 %v3299_v31 }
 0x19d   : > { %v1294_v10 = vmul.f32 %v1268_v61, %v1187_v26  ;;  %v826_v11 = vcvt.s32.f32 %v810_v1  ;;  %v1046_v12 = vrot.slane %v1016_v60, %v3164_v24  ;;  %v780_v27 = vunpack.c.3.s8 %v3299_v31 }
 0x19e   : > { %1806 = vmatpush3.bf16.msra.mxu1 %v1080_v2  ;;  %v964_v0 = vsub.f32 %v825_v39, %v939_v62  ;;  %v843_v13 = vand.u32 15, %v779_v6  ;;  %v1133_v3 = vcombine.high %v3291_v14, %v3291_v14  ;;  %v1240_v21 = vcombine.high %v3294_v7, %v3294_v7 }
 0x19f   : > { %1807 = vmatprep.subr.bf16.mxu1 %v2488_v5  ;;  %v1303_v17 = vpack.c.bf16 %v1294_v10, %v1293_v4  ;;  %v965_v18 = vsub.f32 %v826_v11, %v939_v62  ;;  %v844_v19 = vand.u32 15, %v780_v27  ;;  %v795_v20 = vshra.s32 %v779_v6, 4  ;;  %v1305_v6 = vld [vmem:[#allocation2] sm:$0xff] }
 0x1a0   : > { %v1071_v23 = vmul.f32 %v1046_v12, %v964_v0  ;;  %v859_v28 = vcvt.s32.f32 %v843_v13  ;;  %v1165_v29 = vrot.slane %v1133_v3, %v3164_v24  ;;  %v1272_v31 = vrot.slane %v1240_v21, %v3164_v24  ;;  %v1306_v13 = vld [vmem:[#allocation2 + $0x8] sm:$0xff] }
 0x1a1   : > { %1788 = vmatpush3.bf16.msra.mxu0 %v1303_v17  ;;  %v1072_v34 = vmul.f32 %v1046_v12, %v965_v18  ;;  %v860_v35 = vcvt.s32.f32 %v844_v19  ;;  %v796_v36 = vshra.s32 %v780_v27, 4  ;;  %v811_v14 = vand.u32 15, %v795_v20 }
 0x1a2   : > { %1789 = vmatprep.subr.bf16.mxu0 %v2488_v5  ;;  %v1188_v7 = vsub.f32 %v859_v28, %v1165_v29  ;;  %v911_v37 = vcombine.high %v3305_v45, %v3305_v45  ;;  %v1018_v40 = vcombine.high %v3308_v30, %v3308_v30  ;;  %vm2490_vm0 = vmmov 0  }
 0x1a3   : > { %v1081_v41 = vpack.c.bf16 %v1072_v34, %v1071_v23  ;;  %v1189_v42 = vsub.f32 %v860_v35, %v1165_v29  ;;  %v812_v43 = vand.u32 15, %v796_v36  ;;  %v827_v44 = vcvt.s32.f32 %v811_v14  ;;  %1791 = vmatprep.mubr.msk.bf16.mxu0 %vm2490_vm0, %v2488_v5  ;;  %1811 = vmatprep.mubr.msk.bf16.mxu1 %vm2490_vm0, %v2488_v5  ;;  %v1399_v23 = vld [vmem:[%s3635_s7] sm:$0xff] (!%p1750_p9)  ;;  %v1400_v29 = vld [vmem:[%s3635_s7 + $0x8] sm:$0xff] (!%p1750_p9) }
 0x1a4   : > { %v1295_v46 = vmul.f32 %v1272_v31, %v1188_v7  ;;  %v943_v47 = vrot.slane %v911_v37, %v3164_v24  ;;  %v1050_v33 = vrot.slane %v1018_v40, %v3164_v24  ;;  %v2491_v28 = vmov (!%p1750_p9), 0   ;;  %v1751_v34 = vld [vmem:[%s718_s19] ss:$0 sm:$0xff] (!%p1750_p9) }
 0x1a5   : > { %1808 = vmatpush3.bf16.msra.mxu1 %v1081_v41  ;;  %v1296_v45 = vmul.f32 %v1272_v31, %v1189_v42  ;;  %v828_v30 = vcvt.s32.f32 %v812_v43  ;;  %2041 = vset.pattern.permute.xlu0 (!%p1750_p9), %v2491_v28 }
 0x1a6   : > { %1809 = vmatprep.subr.bf16.mxu1 %v2488_v5  ;;  %v966_v48 = vsub.f32 %v827_v44, %v943_v47  ;;  %1403 = vperm.xlu0 (!%p1750_p9), %2041, %v1399_v23  }
 0x1a7   : > { %v1304_v49 = vpack.c.bf16 %v1296_v45, %v1295_v46  ;;  %v967_v50 = vsub.f32 %v828_v30, %v943_v47 }
 0x1a8   : > { %v1073_v51 = vmul.f32 %v1050_v33, %v966_v48 }
 0x1a9   : > { %1790 = vmatpush3.bf16.msra.mxu0 %v1304_v49  ;;  %v1074_v52 = vmul.f32 %v1050_v33, %v967_v50 }
 0x1aa   : > { %1408 = vperm.xlu0 (!%p1750_p9), %2041, %v1400_v29  }
 0x1ab   : > { %v1082_v32 = vpack.c.bf16 %v1074_v52, %v1073_v51 }
 0x1ad   : > { %1810 = vmatpush3.bf16.msra.mxu1 %v1082_v32 }
 0x1e9   : > { %v734_v24 = vpop.permute.xlu0 %733 }
 0x1ea   : > { %v741_v8 = vmul.f32 %v734_v24, %v729_v53  ;;  %v752_v15 = vmul.f32 %v750_v54, %v734_v24 }
 0x1ec   : > { %v1815_v5 = vround.rtne.f32 %v741_v8  ;;  %v1817_v16 = vround.rtne.f32 %v752_v15 }
 0x1ed   : > { %v739_v58 = vpop.permute.xlu0 %738 }
 0x1ee   : > { %v742_v59 = vmul.f32 %v739_v58, %v730_v57  ;;  %v753_v61 = vmul.f32 %v751_v9, %v739_v58  ;;  %v745_v38 = vmax.f32 %v1815_v5, -128.0  ;;  %v756_v63 = vmax.f32 %v1817_v16, -128.0 }
 0x1f0   : > { %v1816_v22 = vround.rtne.f32 %v742_v59  ;;  %v1818_v25 = vround.rtne.f32 %v753_v61  ;;  %v747_v26 = vmin.f32 %v745_v38, 127.0  ;;  %v758_v1 = vmin.f32 %v756_v63, 127.0 }
 0x1f2   : > { %v746_v55 = vmax.f32 %v1816_v22, -128.0  ;;  %v757_v56 = vmax.f32 %v1818_v25, -128.0 }
 0x1f4   : > { %v748_v39 = vmin.f32 %v746_v55, 127.0  ;;  %v759_v60 = vmin.f32 %v757_v56, 127.0 }
 0x1f6   : > { %v760_v2 = vpack.c.bf16 %v759_v60, %v758_v1  ;;  %v749_v4 = vpack.c.bf16 %v748_v39, %v747_v26 }
 0x1f8   : > { %1792 = vmatmul.mubr.bf16.vlgmr.msra.gmra.mrb[0].mxu0 %v760_v2  ;;  %1812 = vmatmul.mubr.bf16.vlgmr.msra.gmra.mrb[0].mxu1 %v749_v4 }
 0x225   : > { %v1404_v35 = vpop.permute.xlu0 (!%p1750_p9), %1403 }
 0x229   : > { %v1409_v37 = vpop.permute.xlu0 (!%p1750_p9), %1408 }
 0x2cb   : > { %v1341_v62 = vpop.f32.mrb[0].mxu0  ;;  %v1382_v10 = vpop.f32.mrb[0].mxu1 }
 0x2cc   : > { %v1383_v11 = vadd.f32 %v1382_v10, %v1341_v62  ;;  %v1793_v12 = vpop.f32.mrb[1].mxu0  ;;  %v1813_v27 = vpop.f32.mrb[1].mxu1  ;;  %1396 = sbr.rel (%p1750_p9) target bundleno = 735 (0x2df), region = 96 }
 0x2cd   : > { %v1344_v0 = vpop.f32.mrb[2].mxu0  ;;  %v1385_v3 = vpop.f32.mrb[2].mxu1 }
 0x2ce   : > { %v1389_v21 = vadd.f32 %v1383_v11, %v1305_v6  ;;  %v1386_v17 = vadd.f32 %v1385_v3, %v1344_v0  ;;  %v1794_v18 = vpop.f32.mrb[3].mxu0  ;;  %v1814_v19 = vpop.f32.mrb[3].mxu1 }
 0x2d0   : > { %1391 = vst [vmem:[#allocation2] sm:$0xff] %v1389_v21  ;;  %v1390_v20 = vadd.f32 %v1386_v17, %v1306_v13 }
 0x2d2   : > { %1392 = vst [vmem:[#allocation2 + $0x8] sm:$0xff] %v1390_v20 }
 0x2d7   : > { %v1397_v31 = vld [vmem:[#allocation2] sm:$0xff] }
 0x2d8   : > { %v1411_v36 = vmul.f32 %v1404_v35, %v1397_v31 }
 0x2d9   : > { %v1398_v14 = vld [vmem:[#allocation2 + $0x8] sm:$0xff] }
 0x2da   : > { %v1420_v7 = vadd.f32 %v1751_v34, %v1411_v36  ;;  %v1412_v40 = vmul.f32 %v1409_v37, %v1398_v14 }
 0x2dc   : > { %1422 = vst [vmem:[%s3134_s6] sm:$0xff] %v1420_v7  ;;  %v1421_v41 = vadd.f32 %v1751_v34, %v1412_v40 }
 0x2de   : > { %1423 = vst [vmem:[%s3134_s6 + $0x8] sm:$0xff] %v1421_v41 }
 0x2df PF: > { %s3637_s18 = sld [smem:[#allocation36_spill]]  ;;  %s3639_s8 = sld [smem:[#allocation45_spill]] }
 0x2e0   : > { %s3640_s24 = sld [smem:[#allocation58_spill]]  ;;  %s1440_s19 = sshll.u32 %s3134_s6, 4  ;;  %s3378_s19 = int_to_ptr.vmem [resolvable:$true] %s1440_s19 }
 0x2e1   : > { %s3382_s11 = scalar_lea.sflag [#allocation5], %s695_s21  ;;  %s2255_s17 = scalar_lea.vmem %s3378_s19, 256 }
 0x2e2   : > { %p2256_p4 = scmp.ne.s32.totalorder %s3378_s19, %s2255_s17  ;;  %s2492_s25 = smov [#allocation15]  }
 0x2e3   : > { %s2259_s16 = sshll.u32 %s2492_s25, 4  ;;  %s2260_s16 = int_to_ptr.vmem [resolvable:$false] %s2259_s16 }
 0x2e4   : > { %s2261_s13 = scalar_lea.vmem %s2260_s16, 512  ;;  %p2262_p2 = scmp.lt.s32.totalorder %s3378_s19, %s2260_s16 }
 0x2e5   : > { %s1753_s0 = sshll.u32 %s3637_s18, 7  ;;  %p3642_p7 = scmp.ne.s32.totalorder %s3639_s8, 0 }
 0x2e6   : > { %s3641_s9 = smov %s3640_s24  ;;  %s3375_s29 = scalar_lea.hbm %s3640_s24, %s1753_s0 }
 0x2e7   : > { %p2257_p5 = pnand %p2256_p4, %p3642_p7  ;;  %p2263_p13 = scmp.lt.s32.totalorder %s2261_s13, %s2255_s17 }
 0x2e9   : > { %p2258_p3 = pneg %p2257_p5  ;;  %p2264_p0 = por %p2263_p13, %p2262_p2 }
 0x2eb   : > { %p2265_p6 = pnand %p2264_p0, %p2258_p3 }
 0x2ed   : > { %2268 = shalt.err (!%p2265_p6)
}
 0x2ee   : > { %s2269_s21 = scalar_lea.hbm %s3375_s29, 256  ;;  %s2273_s28 = scalar_lea.hbm %s3641_s9, 512 }
 0x2ef   : > { %p2270_p12 = scmp.ne.s32.totalorder %s3375_s29, %s2269_s21  ;;  %p2274_p11 = scmp.lt.u32.totalorder %s3375_s29, %s3641_s9 }
 0x2f0   : > { %p2275_p10 = scmp.lt.u32.totalorder %s2273_s28, %s2269_s21  ;;  %p2277_p4 = scmp.lt.u32.totalorder %s2269_s21, %s3375_s29 }
 0x2f1   : > { %p2271_p1 = pnand %p2270_p12, %p3642_p7 }
 0x2f2   : > { %p2276_p9 = por %p2275_p10, %p2274_p11 }
 0x2f3   : > { %p2272_p8 = pneg %p2271_p1 }
 0x2f4   : > { %p2278_p5 = por %p2277_p4, %p2276_p9 }
 0x2f6   : > { %p2279_p3 = pnand %p2278_p5, %p2272_p8 }
 0x2f8   : > { %2282 = shalt.err (!%p2279_p3)
}
 0x2f9   : > { %s2493_s5 = smov 128   ;;  %s2494_s18 = smov 256  }
 0x2fa   : > { %s2495_s30 = smov 8  }
 0x2fb   : > { %1833 = dma.vmem_to_hbm [thread:$0]  (%p3642_p7), %s3378_s19, 256, %s3375_s29, %s3382_s11, %s2493_s5, %s2494_s18, %s2495_s30  }
 0x2fc PF: > { %s3643_s0 = sld [smem:[#allocation24_spill]]  ;;  %s3644_s27 = sld [smem:[#allocation46_spill]] }
 0x2fd   : > { %p1862_p2 = scmp.ge.s32.totalorder %s2473_s12, 2 }
 0x302   : > { %s1455_s14 = sand.u32 1, %s3643_s0   ;;  %p3645_p13 = scmp.ne.s32.totalorder %s3644_s27, 0 }
 0x303   : > { %s1456_s24 = scalar_lea.sflag [#allocation5], %s1455_s14 }
 0x304   : > { %p1858_p0 = pnand %p1862_p2, %p3645_p13 }
 0x306   : > { %2392 = dma.done.wait (!%p1858_p0), %s1456_s24, 256  }
 0x307   : > { %2394 = vsyncadd (!%p1858_p0), %s1456_s24, 4294967040  ;;  %s35_s12 = sadd.s32 1, %s2473_s12   ;;  %s3648_s13 = sld [smem:[#allocation25_spill]] }
 0x308   : > { %p3411_p6 = scmp.ge.s32.totalorder %s35_s12, 6   ;;  %s3649_s14 = sld [smem:[#allocation26_spill]] }
 0x309   : > { %s3650_s15 = sld [smem:[#allocation44_spill]]  ;;  %s3651_s16 = sld [smem:[#allocation28_spill]] }
 0x30a   : > { %s3652_s17 = sld [smem:[#allocation29_spill]]  ;;  %s3653_s8 = sld [smem:[#allocation30_spill]] }
 0x30b   : > { %s3654_s21 = sld [smem:[#allocation43_spill]]  ;;  %s3656_s24 = sld [smem:[#allocation40_spill]] }
 0x30c   : > { %s3655_s29 = sld [smem:[#allocation31_spill]]  ;;  %s3657_s11 = sld [smem:[#allocation33_spill]] }
 0x30d   : > { %s3658_s26 = sld [smem:[#allocation34_spill]]  ;;  %s3660_s28 = sld [smem:[#allocation37_spill]] }
 0x30e   : > { %s3659_s27 = sld [smem:[#allocation47_spill]]  ;;  %s3661_s6 = sld [smem:[#allocation38_spill]] }
 0x30f   : > { %s3662_s30 = sld [smem:[#allocation39_spill]]  ;;  %s3663_s1 = sld [smem:[#allocation42_spill]] }
 0x310   : > { %s3665_s18 = smov %s3003_s22  ;;  %s3666_s19 = smov %s2425_s20 }
 0x311   : > { %s3667_s20 = smov %s3653_s8  ;;  %s3668_s22 = smov %s2437_s23 }
 0x312   : > { %s3669_s23 = smov %s3655_s29  ;;  %s3670_s25 = smov %s3657_s11 }
 0x313   :  { %34 = sbr.rel (!%p3411_p6) target bundleno = 31 (0x1f), region = 194 }
 0x314   : > { %s3671_s29 = smov %s3661_s6 }
 0x315   : > { %s3672_s11 = smov %s3663_s1 }
 0x31a   :  { %1461 = vsyncpa [#allocation4], 1 }
 0x31b   :  { %1463 = vsyncpa [#allocation4 + $0x1], 1 }
 0x31c   :  { %1464 = vsyncpa [#allocation7], 1 }
 0x31d   :  { %1466 = vsyncpa [#allocation7 + $0x1], 1 }
 0x31e   :  { %1467 = vsyncpa [#allocation10], 1 }
 0x31f   :  { %1469 = vsyncpa [#allocation10 + $0x1], 1 }
 0x320   :  { %1470 = vsyncpa [#allocation13], 1 }
 0x321   :  { %1472 = vsyncpa [#allocation13 + $0x1], 1 }
 0x322   :  { %1473 = vsyncpa [#allocation5], 1 }
 0x323   :  { %1475 = vsyncpa [#allocation5 + $0x1], 1 }

</bundles_post_ra>
